<compile_context>
chip_gen: v5e
topology: v5e:2x2
jax: 0.10.0
libtpu: 0.0.40
codegen_flags: <defaults>
</compile_context>

<pallas_src>
import functools

import jax
import jax.numpy as jnp
from jax.experimental import pallas as pl
from jax.experimental.pallas import tpu as pltpu

# ----------------------------- configuration --------------------------------
B = 2            # batch
NQ = 8           # number of queries
D_MODEL = 32     # hidden size
N_HEADS = 4
D_HEAD = D_MODEL // N_HEADS
D_FFN = 64
N_LEVELS = 3     # number of feature levels
NUM_LAYERS = 3
RETURN_INTERMEDIATE = True
SPATIAL_SHAPES = ((8, 8), (4, 4), (2, 2))
S_TOTAL = sum(h * w for h, w in SPATIAL_SHAPES)  # 84 flattened src tokens


# ------------------- fused full-decoder-stack kernel -------------------------
def _decoder_stack_kernel(
    # per-batch data blocks (constant across the layer axis)
    x_ref, qpos_ref, rp_ref, src_ref, bias_ref,
    # self-attention params (leading layer dim of size 1 in each block)
    w_sa_qk_ref, b_sa_qk_ref, w_sa_v_ref, b_sa_v_ref, w_sa_o_ref, b_sa_o_ref,
    # cross-attention params
    w_ca_q_ref, b_ca_q_ref, w_ca_r_ref, b_ca_r_ref, w_ca_kv_ref, b_ca_kv_ref,
    w_ca_o_ref, b_ca_o_ref,
    # FFN params
    ffn_w1_ref, ffn_b1_ref, ffn_w2_ref, ffn_b2_ref,
    # layer norms (stacked per layer: [ln1, ln2, ln3])
    ln_g_ref, ln_b_ref,
    # output (per-layer intermediate stack)
    o_ref,
    # VMEM carry of the query state across the layer axis
    x_carry,
):
  f32 = jnp.float32
  layer = pl.program_id(1)

  # Initialize the carry from tgt at the first layer of each batch element.
  @pl.when(layer == 0)
  def _():
    x_carry[...] = x_ref[0].astype(f32)

  x = x_carry[...]               # (NQ, D)
  qpos = qpos_ref[0].astype(f32)  # (NQ, D)
  rp = rp_ref[0].astype(f32)      # (NQ, L*3)
  src = src_ref[0].astype(f32)    # (S, D)
  bias = bias_ref[0].astype(f32)  # (1, S) additive padding-mask bias

  nq, d = x.shape

  def layer_norm(v, idx):
    g = ln_g_ref[0, idx]          # (1, D)
    b = ln_b_ref[0, idx]          # (1, D)
    mu = jnp.mean(v, axis=-1, keepdims=True)
    var = jnp.mean((v - mu) ** 2, axis=-1, keepdims=True)
    return (v - mu) * jax.lax.rsqrt(var + 1e-5) * g + b

  def mha(q, k, v, add_bias, w_o, b_o):
    # q: (NQ, D), k/v: (S, D); 1/sqrt(Dh) is pre-folded into the K projection.
    # Head merge + output projection are fused as a sum over per-head slices
    # of w_o, avoiding any in-kernel concatenation / transposes.
    out = jnp.zeros((nq, d), f32) + b_o
    for h in range(N_HEADS):
      lo = h * D_HEAD
      hi = lo + D_HEAD
      qh = q[:, lo:hi]                                     # (NQ, Dh)
      kh = k[:, lo:hi]                                     # (S,  Dh)
      vh = v[:, lo:hi]                                     # (S,  Dh)
      s = jax.lax.dot_general(qh, kh, (((1,), (1,)), ((), ())),
                              preferred_element_type=f32)   # (NQ, S)
      if add_bias is not None:
        s = s + add_bias
      m = jnp.max(s, axis=-1, keepdims=True)
      p = jnp.exp(s - m)
      denom = jnp.sum(p, axis=-1, keepdims=True)
      p = p * pl.reciprocal(denom, approx=True)
      ctx = jnp.dot(p, vh, preferred_element_type=f32)      # (NQ, Dh)
      out = out + jnp.dot(ctx, w_o[lo:hi, :], preferred_element_type=f32)
    return out

  # ---------------- self attention ----------------
  q_in = x + qpos
  qk = jnp.dot(q_in, w_sa_qk_ref[0], preferred_element_type=f32) + b_sa_qk_ref[0]
  v_sa = jnp.dot(x, w_sa_v_ref[0], preferred_element_type=f32) + b_sa_v_ref[0]
  attn = mha(qk[:, :d], qk[:, d:], v_sa, None, w_sa_o_ref[0], b_sa_o_ref[0])
  x = layer_norm(x + attn, 0)

  # ------- cross attention over src (reference points injected into Q) -------
  q_in = x + qpos
  q_c = (jnp.dot(q_in, w_ca_q_ref[0], preferred_element_type=f32) + b_ca_q_ref[0]
         + jnp.dot(rp, w_ca_r_ref[0], preferred_element_type=f32) + b_ca_r_ref[0])
  kv = jnp.dot(src, w_ca_kv_ref[0], preferred_element_type=f32) + b_ca_kv_ref[0]
  attn = mha(q_c, kv[:, :d], kv[:, d:], bias, w_ca_o_ref[0], b_ca_o_ref[0])
  x = layer_norm(x + attn, 1)

  # ---------------- FFN ----------------
  hdn = jnp.maximum(
      jnp.dot(x, ffn_w1_ref[0], preferred_element_type=f32) + ffn_b1_ref[0], 0.0)
  hdn = jnp.dot(hdn, ffn_w2_ref[0], preferred_element_type=f32) + ffn_b2_ref[0]
  x = layer_norm(x + hdn, 2)

  # Carry to the next layer and emit this layer's intermediate output.
  x_carry[...] = x
  o_ref[0, 0] = x.astype(o_ref.dtype)


def _weight_spec(arr):
  """Layer-stacked weight: block = one layer's slice, indexed by the layer axis."""
  nd = arr.ndim
  return pl.BlockSpec((1,) + arr.shape[1:],
                      lambda bi, li, _nd=nd: (li,) + (0,) * (_nd - 1))


def fused_decoder_stack(stacked_weights, tgt, query_pos, rp_flat, src, pad_bias):
  """Whole decoder stack in a single pallas_call; grid = (batch, num_layers)."""
  num_layers = stacked_weights[0].shape[0]
  b, nq, d = tgt.shape
  s = src.shape[1]
  rdim = rp_flat.shape[-1]
  data = (tgt, query_pos, rp_flat, src, pad_bias)
  data_specs = [
      pl.BlockSpec((1, nq, d), lambda bi, li: (bi, 0, 0)),
      pl.BlockSpec((1, nq, d), lambda bi, li: (bi, 0, 0)),
      pl.BlockSpec((1, nq, rdim), lambda bi, li: (bi, 0, 0)),
      pl.BlockSpec((1, s, d), lambda bi, li: (bi, 0, 0)),
      pl.BlockSpec((1, 1, s), lambda bi, li: (bi, 0, 0)),
  ]
  weight_specs = [_weight_spec(w) for w in stacked_weights]
  return pl.pallas_call(
      _decoder_stack_kernel,
      grid=(b, num_layers),
      in_specs=data_specs + weight_specs,
      out_specs=pl.BlockSpec((1, 1, nq, d), lambda bi, li: (li, bi, 0, 0)),
      out_shape=jax.ShapeDtypeStruct((num_layers, b, nq, d), jnp.float32),
      scratch_shapes=[pltpu.VMEM((nq, d), jnp.float32)],
      compiler_params=pltpu.CompilerParams(
          dimension_semantics=("parallel", "arbitrary")),  # batch -> 2 TCs on v7x
  )(*data, *stacked_weights)


# ------------------------------ decoder wrapper --------------------------------
def deformable_transformer_decoder(layer_params, tgt, reference_points, src,
                                   src_spatial_shapes, src_level_start_index,
                                   src_valid_ratios, query_pos=None,
                                   src_padding_mask=None,
                                   return_intermediate=False):
  del src_spatial_shapes, src_level_start_index  # kept for signature parity
  if reference_points.shape[-1] != 3:
    raise ValueError("Currently iterative bbox refinement is not implemented.")

  b, nq, _ = tgt.shape
  s = src.shape[1]

  # Loop-invariant work hoisted out of the layer loop (tiny; plain jnp is
  # cheaper than a kernel launch).
  rp_input = reference_points[:, :, None, :] * src_valid_ratios[:, None, :, :]
  rp_flat = rp_input.reshape(b, nq, -1)                    # (B, NQ, L*3)
  if query_pos is None:
    query_pos = jnp.zeros_like(tgt)
  if src_padding_mask is None:
    pad_bias = jnp.zeros((b, 1, s), jnp.float32)
  else:
    pad_bias = jnp.where(src_padding_mask, -1e9, 0.0).astype(jnp.float32)[:, None, :]

  # Stack each per-layer weight along a leading layer dim.
  stacked = [jnp.stack(ws) for ws in zip(*layer_params)]

  per_layer_out = fused_decoder_stack(stacked, tgt, query_pos, rp_flat, src,
                                      pad_bias)              # (L, B, NQ, D)
  if return_intermediate:
    num_layers = per_layer_out.shape[0]
    inter_ref_pts = jnp.broadcast_to(
        reference_points[None], (num_layers,) + reference_points.shape)
    return per_layer_out, inter_ref_pts
  return per_layer_out[-1], reference_points


# --------------------------- parameter init -----------------------------------
def init_layer_params(key):
  keys = jax.random.split(key, 16)

  def w(k, shape, scale=0.05):
    return jax.random.normal(k, shape, jnp.float32) * scale

  z = lambda n: jnp.zeros((n,), jnp.float32)
  return {
      "sa_wq": w(keys[0], (D_MODEL, D_MODEL)), "sa_bq": z(D_MODEL),
      "sa_wk": w(keys[1], (D_MODEL, D_MODEL)), "sa_bk": z(D_MODEL),
      "sa_wv": w(keys[2], (D_MODEL, D_MODEL)), "sa_bv": z(D_MODEL),
      "sa_wo": w(keys[3], (D_MODEL, D_MODEL)), "sa_bo": z(D_MODEL),
      "ca_wq": w(keys[4], (D_MODEL, D_MODEL)), "ca_bq": z(D_MODEL),
      "ca_wr": w(keys[5], (N_LEVELS * 3, D_MODEL)), "ca_br": z(D_MODEL),
      "ca_wk": w(keys[6], (D_MODEL, D_MODEL)), "ca_bk": z(D_MODEL),
      "ca_wv": w(keys[7], (D_MODEL, D_MODEL)), "ca_bv": z(D_MODEL),
      "ca_wo": w(keys[8], (D_MODEL, D_MODEL)), "ca_bo": z(D_MODEL),
      "ffn_w1": w(keys[9], (D_MODEL, D_FFN)), "ffn_b1": z(D_FFN),
      "ffn_w2": w(keys[10], (D_FFN, D_MODEL)), "ffn_b2": z(D_MODEL),
      "ln1_g": jnp.ones((D_MODEL,), jnp.float32), "ln1_b": z(D_MODEL),
      "ln2_g": jnp.ones((D_MODEL,), jnp.float32), "ln2_b": z(D_MODEL),
      "ln3_g": jnp.ones((D_MODEL,), jnp.float32), "ln3_b": z(D_MODEL),
  }


def pack_layer_params(p):
  """Fuse/concatenate raw params for the fused kernel; fold 1/sqrt(Dh) into K."""
  scale = 1.0 / float(D_HEAD) ** 0.5
  w_sa_qk = jnp.concatenate([p["sa_wq"], p["sa_wk"] * scale], axis=1)   # (D, 2D)
  b_sa_qk = jnp.concatenate([p["sa_bq"], p["sa_bk"] * scale]).reshape(1, -1)
  w_ca_kv = jnp.concatenate([p["ca_wk"] * scale, p["ca_wv"]], axis=1)   # (D, 2D)
  b_ca_kv = jnp.concatenate([p["ca_bk"] * scale, p["ca_bv"]]).reshape(1, -1)
  ln_g = jnp.stack([p["ln1_g"], p["ln2_g"], p["ln3_g"]])[:, None, :]    # (3, 1, D)
  ln_b = jnp.stack([p["ln1_b"], p["ln2_b"], p["ln3_b"]])[:, None, :]
  return (
      w_sa_qk, b_sa_qk,
      p["sa_wv"], p["sa_bv"].reshape(1, -1),
      p["sa_wo"], p["sa_bo"].reshape(1, -1),
      p["ca_wq"], p["ca_bq"].reshape(1, -1),
      p["ca_wr"], p["ca_br"].reshape(1, -1),
      w_ca_kv, b_ca_kv,
      p["ca_wo"], p["ca_bo"].reshape(1, -1),
      p["ffn_w1"], p["ffn_b1"].reshape(1, -1),
      p["ffn_w2"], p["ffn_b2"].reshape(1, -1),
      ln_g, ln_b,
  )


# --------------------------------- main ----------------------------------------
if __name__ == "__main__":
  root = jax.random.PRNGKey(0)
  k_tgt, k_ref, k_src, k_qpos, k_vr, k_params = jax.random.split(root, 6)

  tgt = jax.random.normal(k_tgt, (B, NQ, D_MODEL), jnp.float32)
  reference_points = jax.random.uniform(k_ref, (B, NQ, 3), jnp.float32)
  src = jax.random.normal(k_src, (B, S_TOTAL, D_MODEL), jnp.float32)
  query_pos = jax.random.normal(k_qpos, (B, NQ, D_MODEL), jnp.float32)
  src_valid_ratios = jax.random.uniform(
      k_vr, (B, N_LEVELS, 3), jnp.float32, minval=0.5, maxval=1.0)
  src_spatial_shapes = jnp.array(SPATIAL_SHAPES, jnp.int32)
  src_level_start_index = jnp.array(
      [0] + list(jnp.cumsum(jnp.array([h * w for h, w in SPATIAL_SHAPES]))[:-1]),
      jnp.int32)
  # mask out the last 4 src tokens of batch element 1
  src_padding_mask = jnp.zeros((B, S_TOTAL), jnp.bool_).at[1, -4:].set(True)

  layer_keys = jax.random.split(k_params, NUM_LAYERS)
  layer_params = [pack_layer_params(init_layer_params(k)) for k in layer_keys]

  fwd = jax.jit(functools.partial(deformable_transformer_decoder,
                                  return_intermediate=RETURN_INTERMEDIATE))
  out, out_ref_pts = fwd(layer_params, tgt, reference_points, src,
                         src_spatial_shapes, src_level_start_index,
                         src_valid_ratios, query_pos=query_pos,
                         src_padding_mask=src_padding_mask)
  jax.block_until_ready(out)
  jax.block_until_ready(out_ref_pts)

  assert out.shape == (NUM_LAYERS, B, NQ, D_MODEL), out.shape
  assert out_ref_pts.shape == (NUM_LAYERS, B, NQ, 3), out_ref_pts.shape
  assert jnp.all(jnp.isfinite(out))
  print("KERNEL_OK")
</pallas_src>

<mosaic_0001>
module attributes {stable_mosaic.version = 11 : i64} {
  func.func @_decoder_stack_kernel(%arg0: i32, %arg1: i32, %arg2: memref<1x8x32xf32, #tpu.memory_space<vmem>>, %arg3: memref<1x8x32xf32, #tpu.memory_space<vmem>>, %arg4: memref<1x8x9xf32, #tpu.memory_space<vmem>>, %arg5: memref<1x84x32xf32, #tpu.memory_space<vmem>>, %arg6: memref<1x1x84xf32, #tpu.memory_space<vmem>>, %arg7: memref<1x32x64xf32, #tpu.memory_space<vmem>>, %arg8: memref<1x1x64xf32, #tpu.memory_space<vmem>>, %arg9: memref<1x32x32xf32, #tpu.memory_space<vmem>>, %arg10: memref<1x1x32xf32, #tpu.memory_space<vmem>>, %arg11: memref<1x32x32xf32, #tpu.memory_space<vmem>>, %arg12: memref<1x1x32xf32, #tpu.memory_space<vmem>>, %arg13: memref<1x32x32xf32, #tpu.memory_space<vmem>>, %arg14: memref<1x1x32xf32, #tpu.memory_space<vmem>>, %arg15: memref<1x9x32xf32, #tpu.memory_space<vmem>>, %arg16: memref<1x1x32xf32, #tpu.memory_space<vmem>>, %arg17: memref<1x32x64xf32, #tpu.memory_space<vmem>>, %arg18: memref<1x1x64xf32, #tpu.memory_space<vmem>>, %arg19: memref<1x32x32xf32, #tpu.memory_space<vmem>>, %arg20: memref<1x1x32xf32, #tpu.memory_space<vmem>>, %arg21: memref<1x32x64xf32, #tpu.memory_space<vmem>>, %arg22: memref<1x1x64xf32, #tpu.memory_space<vmem>>, %arg23: memref<1x64x32xf32, #tpu.memory_space<vmem>>, %arg24: memref<1x1x32xf32, #tpu.memory_space<vmem>>, %arg25: memref<1x3x1x32xf32, #tpu.memory_space<vmem>>, %arg26: memref<1x3x1x32xf32, #tpu.memory_space<vmem>>, %arg27: memref<1x1x8x32xf32, #tpu.memory_space<vmem>>, %arg28: memref<8x32xf32, #tpu.memory_space<vmem>>) attributes {dimension_semantics = [#tpu.dimension_semantics<parallel>, #tpu.dimension_semantics<arbitrary>], iteration_bounds = array<i64: 2, 3>, scalar_prefetch = 0 : i64, scratch_operands = 1 : i64, tpu.core_type = #tpu.core_type<tc>, window_params = [{transform_indices = @transform_0, window_bounds = array<i64: 1, 8, 32>}, {transform_indices = @transform_1, window_bounds = array<i64: 1, 8, 32>}, {transform_indices = @transform_2, window_bounds = array<i64: 1, 8, 9>}, {transform_indices = @transform_3, window_bounds = array<i64: 1, 84, 32>}, {transform_indices = @transform_4, window_bounds = array<i64: 1, 1, 84>}, {transform_indices = @transform_5, window_bounds = array<i64: 1, 32, 64>}, {transform_indices = @transform_6, window_bounds = array<i64: 1, 1, 64>}, {transform_indices = @transform_7, window_bounds = array<i64: 1, 32, 32>}, {transform_indices = @transform_8, window_bounds = array<i64: 1, 1, 32>}, {transform_indices = @transform_9, window_bounds = array<i64: 1, 32, 32>}, {transform_indices = @transform_10, window_bounds = array<i64: 1, 1, 32>}, {transform_indices = @transform_11, window_bounds = array<i64: 1, 32, 32>}, {transform_indices = @transform_12, window_bounds = array<i64: 1, 1, 32>}, {transform_indices = @transform_13, window_bounds = array<i64: 1, 9, 32>}, {transform_indices = @transform_14, window_bounds = array<i64: 1, 1, 32>}, {transform_indices = @transform_15, window_bounds = array<i64: 1, 32, 64>}, {transform_indices = @transform_16, window_bounds = array<i64: 1, 1, 64>}, {transform_indices = @transform_17, window_bounds = array<i64: 1, 32, 32>}, {transform_indices = @transform_18, window_bounds = array<i64: 1, 1, 32>}, {transform_indices = @transform_19, window_bounds = array<i64: 1, 32, 64>}, {transform_indices = @transform_20, window_bounds = array<i64: 1, 1, 64>}, {transform_indices = @transform_21, window_bounds = array<i64: 1, 64, 32>}, {transform_indices = @transform_22, window_bounds = array<i64: 1, 1, 32>}, {transform_indices = @transform_23, window_bounds = array<i64: 1, 3, 1, 32>}, {transform_indices = @transform_24, window_bounds = array<i64: 1, 3, 1, 32>}, {transform_indices = @transform_25, window_bounds = array<i64: 1, 1, 8, 32>}]} {
    %c0_i32 = arith.constant 0 : i32
    %0 = arith.cmpi eq, %arg1, %c0_i32 : i32
    %1 = arith.extui %0 : i1 to i32
    %c0_i32_0 = arith.constant 0 : i32
    %2 = arith.cmpi ne, %1, %c0_i32_0 : i32
    scf.if %2 {
      %c0_160 = arith.constant 0 : index
      %c0_161 = arith.constant 0 : index
      %c0_162 = arith.constant 0 : index
      %321 = vector.load %arg2[%c0_160, %c0_161, %c0_162] : memref<1x8x32xf32, #tpu.memory_space<vmem>>, vector<1x8x32xf32>
      %322 = vector.shape_cast %321 : vector<1x8x32xf32> to vector<8x32xf32>
      %c0_163 = arith.constant 0 : index
      %c0_164 = arith.constant 0 : index
      %323 = vector.load %arg28[%c0_163, %c0_164] : memref<8x32xf32, #tpu.memory_space<vmem>>, vector<8x32xf32>
      tpu.vector_store %arg28[%c0_163, %c0_164], %322 {strides = array<i32>} : memref<8x32xf32, #tpu.memory_space<vmem>>, vector<8x32xf32>,
    } else {
    }
    %c0 = arith.constant 0 : index
    %c0_1 = arith.constant 0 : index
    %3 = vector.load %arg28[%c0, %c0_1] : memref<8x32xf32, #tpu.memory_space<vmem>>, vector<8x32xf32>
    %c0_2 = arith.constant 0 : index
    %c0_3 = arith.constant 0 : index
    %c0_4 = arith.constant 0 : index
    %4 = vector.load %arg3[%c0_2, %c0_3, %c0_4] : memref<1x8x32xf32, #tpu.memory_space<vmem>>, vector<1x8x32xf32>
    %5 = vector.shape_cast %4 : vector<1x8x32xf32> to vector<8x32xf32>
    %c0_5 = arith.constant 0 : index
    %c0_6 = arith.constant 0 : index
    %c0_7 = arith.constant 0 : index
    %6 = vector.load %arg4[%c0_5, %c0_6, %c0_7] : memref<1x8x9xf32, #tpu.memory_space<vmem>>, vector<1x8x9xf32>
    %7 = vector.shape_cast %6 : vector<1x8x9xf32> to vector<8x9xf32>
    %c0_8 = arith.constant 0 : index
    %c0_9 = arith.constant 0 : index
    %c0_10 = arith.constant 0 : index
    %8 = vector.load %arg5[%c0_8, %c0_9, %c0_10] : memref<1x84x32xf32, #tpu.memory_space<vmem>>, vector<1x84x32xf32>
    %9 = vector.shape_cast %8 : vector<1x84x32xf32> to vector<84x32xf32>
    %c0_11 = arith.constant 0 : index
    %c0_12 = arith.constant 0 : index
    %c0_13 = arith.constant 0 : index
    %10 = vector.load %arg6[%c0_11, %c0_12, %c0_13] : memref<1x1x84xf32, #tpu.memory_space<vmem>>, vector<1x1x84xf32>
    %11 = vector.shape_cast %10 : vector<1x1x84xf32> to vector<1x84xf32>
    %12 = arith.addf %3, %5 : vector<8x32xf32>
    %c0_14 = arith.constant 0 : index
    %c0_15 = arith.constant 0 : index
    %c0_16 = arith.constant 0 : index
    %13 = vector.load %arg7[%c0_14, %c0_15, %c0_16] : memref<1x32x64xf32, #tpu.memory_space<vmem>>, vector<1x32x64xf32>
    %14 = vector.shape_cast %13 : vector<1x32x64xf32> to vector<32x64xf32>
    %cst = arith.constant dense<0.000000e+00> : vector<8x64xf32>
    %15 = tpu.matmul %12, %14, %cst {dimension_numbers = #tpu.dot_dimension_numbers<[1], [0], [0], [1], [0, 0, 1, 1], [], []>} : vector<8x32xf32>, vector<32x64xf32>, vector<8x64xf32> -> vector<8x64xf32>
    %c0_17 = arith.constant 0 : index
    %c0_18 = arith.constant 0 : index
    %c0_19 = arith.constant 0 : index
    %16 = vector.load %arg8[%c0_17, %c0_18, %c0_19] : memref<1x1x64xf32, #tpu.memory_space<vmem>>, vector<1x1x64xf32>
    %17 = vector.shape_cast %16 : vector<1x1x64xf32> to vector<1x64xf32>
    %18 = vector.broadcast %17 : vector<1x64xf32> to vector<8x64xf32>
    %19 = arith.addf %15, %18 : vector<8x64xf32>
    %c0_20 = arith.constant 0 : index
    %c0_21 = arith.constant 0 : index
    %c0_22 = arith.constant 0 : index
    %20 = vector.load %arg9[%c0_20, %c0_21, %c0_22] : memref<1x32x32xf32, #tpu.memory_space<vmem>>, vector<1x32x32xf32>
    %21 = vector.shape_cast %20 : vector<1x32x32xf32> to vector<32x32xf32>
    %cst_23 = arith.constant dense<0.000000e+00> : vector<8x32xf32>
    %22 = tpu.matmul %3, %21, %cst_23 {dimension_numbers = #tpu.dot_dimension_numbers<[1], [0], [0], [1], [0, 0, 1, 1], [], []>} : vector<8x32xf32>, vector<32x32xf32>, vector<8x32xf32> -> vector<8x32xf32>
    %c0_24 = arith.constant 0 : index
    %c0_25 = arith.constant 0 : index
    %c0_26 = arith.constant 0 : index
    %23 = vector.load %arg10[%c0_24, %c0_25, %c0_26] : memref<1x1x32xf32, #tpu.memory_space<vmem>>, vector<1x1x32xf32>
    %24 = vector.shape_cast %23 : vector<1x1x32xf32> to vector<1x32xf32>
    %25 = vector.broadcast %24 : vector<1x32xf32> to vector<8x32xf32>
    %26 = arith.addf %22, %25 : vector<8x32xf32>
    %27 = vector.extract_strided_slice %19 {offsets = [0, 0], sizes = [8, 32], strides = [1, 1]} : vector<8x64xf32> to vector<8x32xf32>
    %28 = vector.extract_strided_slice %19 {offsets = [0, 32], sizes = [8, 32], strides = [1, 1]} : vector<8x64xf32> to vector<8x32xf32>
    %c0_27 = arith.constant 0 : index
    %c0_28 = arith.constant 0 : index
    %c0_29 = arith.constant 0 : index
    %29 = vector.load %arg11[%c0_27, %c0_28, %c0_29] : memref<1x32x32xf32, #tpu.memory_space<vmem>>, vector<1x32x32xf32>
    %30 = vector.shape_cast %29 : vector<1x32x32xf32> to vector<32x32xf32>
    %c0_30 = arith.constant 0 : index
    %c0_31 = arith.constant 0 : index
    %c0_32 = arith.constant 0 : index
    %31 = vector.load %arg12[%c0_30, %c0_31, %c0_32] : memref<1x1x32xf32, #tpu.memory_space<vmem>>, vector<1x1x32xf32>
    %32 = vector.shape_cast %31 : vector<1x1x32xf32> to vector<1x32xf32>
    %cst_33 = arith.constant 0.000000e+00 : f32
    %33 = vector.broadcast %cst_33 : f32 to vector<8x32xf32>
    %34 = vector.broadcast %32 : vector<1x32xf32> to vector<8x32xf32>
    %35 = arith.addf %33, %34 : vector<8x32xf32>
    %36 = vector.extract_strided_slice %27 {offsets = [0, 0], sizes = [8, 8], strides = [1, 1]} : vector<8x32xf32> to vector<8x8xf32>
    %37 = vector.extract_strided_slice %28 {offsets = [0, 0], sizes = [8, 8], strides = [1, 1]} : vector<8x32xf32> to vector<8x8xf32>
    %38 = vector.extract_strided_slice %26 {offsets = [0, 0], sizes = [8, 8], strides = [1, 1]} : vector<8x32xf32> to vector<8x8xf32>
    %cst_34 = arith.constant dense<0.000000e+00> : vector<8x8xf32>
    %39 = tpu.matmul %36, %37, %cst_34 {dimension_numbers = #tpu.dot_dimension_numbers<[1], [1], [0], [0], [0, 0, 1, 0], [], []>} : vector<8x8xf32>, vector<8x8xf32>, vector<8x8xf32> -> vector<8x8xf32>
    %cst_35 = arith.constant dense<0xFF800000> : vector<8xf32>
    %40 = vector.multi_reduction <maximumf>, %39, %cst_35 [1] : vector<8x8xf32> to vector<8xf32>
    %41 = vector.shape_cast %40 : vector<8xf32> to vector<8x1xf32>
    %42 = vector.broadcast %41 : vector<8x1xf32> to vector<8x8xf32>
    %43 = arith.subf %39, %42 : vector<8x8xf32>
    %44 = math.exp %43 : vector<8x8xf32>
    %cst_36 = arith.constant dense<0.000000e+00> : vector<8xf32>
    %45 = vector.multi_reduction <add>, %44, %cst_36 [1] : vector<8x8xf32> to vector<8xf32>
    %46 = vector.shape_cast %45 : vector<8xf32> to vector<8x1xf32>
    %47 = tpu.reciprocal %46 {approx = true} : vector<8x1xf32> -> vector<8x1xf32>
    %48 = vector.broadcast %47 : vector<8x1xf32> to vector<8x8xf32>
    %49 = arith.mulf %44, %48 : vector<8x8xf32>
    %cst_37 = arith.constant dense<0.000000e+00> : vector<8x8xf32>
    %50 = tpu.matmul %49, %38, %cst_37 {dimension_numbers = #tpu.dot_dimension_numbers<[1], [0], [0], [1], [0, 0, 1, 1], [], []>} : vector<8x8xf32>, vector<8x8xf32>, vector<8x8xf32> -> vector<8x8xf32>
    %51 = vector.extract_strided_slice %30 {offsets = [0, 0], sizes = [8, 32], strides = [1, 1]} : vector<32x32xf32> to vector<8x32xf32>
    %cst_38 = arith.constant dense<0.000000e+00> : vector<8x32xf32>
    %52 = tpu.matmul %50, %51, %cst_38 {dimension_numbers = #tpu.dot_dimension_numbers<[1], [0], [0], [1], [0, 0, 1, 1], [], []>} : vector<8x8xf32>, vector<8x32xf32>, vector<8x32xf32> -> vector<8x32xf32>
    %53 = arith.addf %35, %52 : vector<8x32xf32>
    %54 = vector.extract_strided_slice %27 {offsets = [0, 8], sizes = [8, 8], strides = [1, 1]} : vector<8x32xf32> to vector<8x8xf32>
    %55 = vector.extract_strided_slice %28 {offsets = [0, 8], sizes = [8, 8], strides = [1, 1]} : vector<8x32xf32> to vector<8x8xf32>
    %56 = vector.extract_strided_slice %26 {offsets = [0, 8], sizes = [8, 8], strides = [1, 1]} : vector<8x32xf32> to vector<8x8xf32>
    %cst_39 = arith.constant dense<0.000000e+00> : vector<8x8xf32>
    %57 = tpu.matmul %54, %55, %cst_39 {dimension_numbers = #tpu.dot_dimension_numbers<[1], [1], [0], [0], [0, 0, 1, 0], [], []>} : vector<8x8xf32>, vector<8x8xf32>, vector<8x8xf32> -> vector<8x8xf32>
    %cst_40 = arith.constant dense<0xFF800000> : vector<8xf32>
    %58 = vector.multi_reduction <maximumf>, %57, %cst_40 [1] : vector<8x8xf32> to vector<8xf32>
    %59 = vector.shape_cast %58 : vector<8xf32> to vector<8x1xf32>
    %60 = vector.broadcast %59 : vector<8x1xf32> to vector<8x8xf32>
    %61 = arith.subf %57, %60 : vector<8x8xf32>
    %62 = math.exp %61 : vector<8x8xf32>
    %cst_41 = arith.constant dense<0.000000e+00> : vector<8xf32>
    %63 = vector.multi_reduction <add>, %62, %cst_41 [1] : vector<8x8xf32> to vector<8xf32>
    %64 = vector.shape_cast %63 : vector<8xf32> to vector<8x1xf32>
    %65 = tpu.reciprocal %64 {approx = true} : vector<8x1xf32> -> vector<8x1xf32>
    %66 = vector.broadcast %65 : vector<8x1xf32> to vector<8x8xf32>
    %67 = arith.mulf %62, %66 : vector<8x8xf32>
    %cst_42 = arith.constant dense<0.000000e+00> : vector<8x8xf32>
    %68 = tpu.matmul %67, %56, %cst_42 {dimension_numbers = #tpu.dot_dimension_numbers<[1], [0], [0], [1], [0, 0, 1, 1], [], []>} : vector<8x8xf32>, vector<8x8xf32>, vector<8x8xf32> -> vector<8x8xf32>
    %69 = vector.extract_strided_slice %30 {offsets = [8, 0], sizes = [8, 32], strides = [1, 1]} : vector<32x32xf32> to vector<8x32xf32>
    %cst_43 = arith.constant dense<0.000000e+00> : vector<8x32xf32>
    %70 = tpu.matmul %68, %69, %cst_43 {dimension_numbers = #tpu.dot_dimension_numbers<[1], [0], [0], [1], [0, 0, 1, 1], [], []>} : vector<8x8xf32>, vector<8x32xf32>, vector<8x32xf32> -> vector<8x32xf32>
    %71 = arith.addf %53, %70 : vector<8x32xf32>
    %72 = vector.extract_strided_slice %27 {offsets = [0, 16], sizes = [8, 8], strides = [1, 1]} : vector<8x32xf32> to vector<8x8xf32>
    %73 = vector.extract_strided_slice %28 {offsets = [0, 16], sizes = [8, 8], strides = [1, 1]} : vector<8x32xf32> to vector<8x8xf32>
    %74 = vector.extract_strided_slice %26 {offsets = [0, 16], sizes = [8, 8], strides = [1, 1]} : vector<8x32xf32> to vector<8x8xf32>
    %cst_44 = arith.constant dense<0.000000e+00> : vector<8x8xf32>
    %75 = tpu.matmul %72, %73, %cst_44 {dimension_numbers = #tpu.dot_dimension_numbers<[1], [1], [0], [0], [0, 0, 1, 0], [], []>} : vector<8x8xf32>, vector<8x8xf32>, vector<8x8xf32> -> vector<8x8xf32>
    %cst_45 = arith.constant dense<0xFF800000> : vector<8xf32>
    %76 = vector.multi_reduction <maximumf>, %75, %cst_45 [1] : vector<8x8xf32> to vector<8xf32>
    %77 = vector.shape_cast %76 : vector<8xf32> to vector<8x1xf32>
    %78 = vector.broadcast %77 : vector<8x1xf32> to vector<8x8xf32>
    %79 = arith.subf %75, %78 : vector<8x8xf32>
    %80 = math.exp %79 : vector<8x8xf32>
    %cst_46 = arith.constant dense<0.000000e+00> : vector<8xf32>
    %81 = vector.multi_reduction <add>, %80, %cst_46 [1] : vector<8x8xf32> to vector<8xf32>
    %82 = vector.shape_cast %81 : vector<8xf32> to vector<8x1xf32>
    %83 = tpu.reciprocal %82 {approx = true} : vector<8x1xf32> -> vector<8x1xf32>
    %84 = vector.broadcast %83 : vector<8x1xf32> to vector<8x8xf32>
    %85 = arith.mulf %80, %84 : vector<8x8xf32>
    %cst_47 = arith.constant dense<0.000000e+00> : vector<8x8xf32>
    %86 = tpu.matmul %85, %74, %cst_47 {dimension_numbers = #tpu.dot_dimension_numbers<[1], [0], [0], [1], [0, 0, 1, 1], [], []>} : vector<8x8xf32>, vector<8x8xf32>, vector<8x8xf32> -> vector<8x8xf32>
    %87 = vector.extract_strided_slice %30 {offsets = [16, 0], sizes = [8, 32], strides = [1, 1]} : vector<32x32xf32> to vector<8x32xf32>
    %cst_48 = arith.constant dense<0.000000e+00> : vector<8x32xf32>
    %88 = tpu.matmul %86, %87, %cst_48 {dimension_numbers = #tpu.dot_dimension_numbers<[1], [0], [0], [1], [0, 0, 1, 1], [], []>} : vector<8x8xf32>, vector<8x32xf32>, vector<8x32xf32> -> vector<8x32xf32>
    %89 = arith.addf %71, %88 : vector<8x32xf32>
    %90 = vector.extract_strided_slice %27 {offsets = [0, 24], sizes = [8, 8], strides = [1, 1]} : vector<8x32xf32> to vector<8x8xf32>
    %91 = vector.extract_strided_slice %28 {offsets = [0, 24], sizes = [8, 8], strides = [1, 1]} : vector<8x32xf32> to vector<8x8xf32>
    %92 = vector.extract_strided_slice %26 {offsets = [0, 24], sizes = [8, 8], strides = [1, 1]} : vector<8x32xf32> to vector<8x8xf32>
    %cst_49 = arith.constant dense<0.000000e+00> : vector<8x8xf32>
    %93 = tpu.matmul %90, %91, %cst_49 {dimension_numbers = #tpu.dot_dimension_numbers<[1], [1], [0], [0], [0, 0, 1, 0], [], []>} : vector<8x8xf32>, vector<8x8xf32>, vector<8x8xf32> -> vector<8x8xf32>
    %cst_50 = arith.constant dense<0xFF800000> : vector<8xf32>
    %94 = vector.multi_reduction <maximumf>, %93, %cst_50 [1] : vector<8x8xf32> to vector<8xf32>
    %95 = vector.shape_cast %94 : vector<8xf32> to vector<8x1xf32>
    %96 = vector.broadcast %95 : vector<8x1xf32> to vector<8x8xf32>
    %97 = arith.subf %93, %96 : vector<8x8xf32>
    %98 = math.exp %97 : vector<8x8xf32>
    %cst_51 = arith.constant dense<0.000000e+00> : vector<8xf32>
    %99 = vector.multi_reduction <add>, %98, %cst_51 [1] : vector<8x8xf32> to vector<8xf32>
    %100 = vector.shape_cast %99 : vector<8xf32> to vector<8x1xf32>
    %101 = tpu.reciprocal %100 {approx = true} : vector<8x1xf32> -> vector<8x1xf32>
    %102 = vector.broadcast %101 : vector<8x1xf32> to vector<8x8xf32>
    %103 = arith.mulf %98, %102 : vector<8x8xf32>
    %cst_52 = arith.constant dense<0.000000e+00> : vector<8x8xf32>
    %104 = tpu.matmul %103, %92, %cst_52 {dimension_numbers = #tpu.dot_dimension_numbers<[1], [0], [0], [1], [0, 0, 1, 1], [], []>} : vector<8x8xf32>, vector<8x8xf32>, vector<8x8xf32> -> vector<8x8xf32>
    %105 = vector.extract_strided_slice %30 {offsets = [24, 0], sizes = [8, 32], strides = [1, 1]} : vector<32x32xf32> to vector<8x32xf32>
    %cst_53 = arith.constant dense<0.000000e+00> : vector<8x32xf32>
    %106 = tpu.matmul %104, %105, %cst_53 {dimension_numbers = #tpu.dot_dimension_numbers<[1], [0], [0], [1], [0, 0, 1, 1], [], []>} : vector<8x8xf32>, vector<8x32xf32>, vector<8x32xf32> -> vector<8x32xf32>
    %107 = arith.addf %89, %106 : vector<8x32xf32>
    %108 = arith.addf %3, %107 : vector<8x32xf32>
    %c0_54 = arith.constant 0 : index
    %c0_55 = arith.constant 0 : index
    %c0_56 = arith.constant 0 : index
    %c0_57 = arith.constant 0 : index
    %109 = vector.load %arg25[%c0_54, %c0_55, %c0_56, %c0_57] : memref<1x3x1x32xf32, #tpu.memory_space<vmem>>, vector<1x1x1x32xf32>
    %110 = vector.shape_cast %109 : vector<1x1x1x32xf32> to vector<1x32xf32>
    %c0_58 = arith.constant 0 : index
    %c0_59 = arith.constant 0 : index
    %c0_60 = arith.constant 0 : index
    %c0_61 = arith.constant 0 : index
    %111 = vector.load %arg26[%c0_58, %c0_59, %c0_60, %c0_61] : memref<1x3x1x32xf32, #tpu.memory_space<vmem>>, vector<1x1x1x32xf32>
    %112 = vector.shape_cast %111 : vector<1x1x1x32xf32> to vector<1x32xf32>
    %cst_62 = arith.constant dense<0.000000e+00> : vector<8xf32>
    %113 = vector.multi_reduction <add>, %108, %cst_62 [1] : vector<8x32xf32> to vector<8xf32>
    %114 = vector.shape_cast %113 : vector<8xf32> to vector<8x1xf32>
    %cst_63 = arith.constant 3.200000e+01 : f32
    %115 = vector.broadcast %cst_63 : f32 to vector<8x1xf32>
    %116 = arith.divf %114, %115 : vector<8x1xf32>
    %117 = vector.broadcast %116 : vector<8x1xf32> to vector<8x32xf32>
    %118 = arith.subf %108, %117 : vector<8x32xf32>
    %119 = arith.mulf %118, %118 : vector<8x32xf32>
    %cst_64 = arith.constant dense<0.000000e+00> : vector<8xf32>
    %120 = vector.multi_reduction <add>, %119, %cst_64 [1] : vector<8x32xf32> to vector<8xf32>
    %121 = vector.shape_cast %120 : vector<8xf32> to vector<8x1xf32>
    %cst_65 = arith.constant 3.200000e+01 : f32
    %122 = vector.broadcast %cst_65 : f32 to vector<8x1xf32>
    %123 = arith.divf %121, %122 : vector<8x1xf32>
    %124 = vector.broadcast %116 : vector<8x1xf32> to vector<8x32xf32>
    %125 = arith.subf %108, %124 : vector<8x32xf32>
    %cst_66 = arith.constant 9.99999974E-6 : f32
    %126 = vector.broadcast %cst_66 : f32 to vector<8x1xf32>
    %127 = arith.addf %123, %126 : vector<8x1xf32>
    %128 = math.rsqrt %127 : vector<8x1xf32>
    %129 = vector.broadcast %128 : vector<8x1xf32> to vector<8x32xf32>
    %130 = arith.mulf %125, %129 : vector<8x32xf32>
    %131 = vector.broadcast %110 : vector<1x32xf32> to vector<8x32xf32>
    %132 = arith.mulf %130, %131 : vector<8x32xf32>
    %133 = vector.broadcast %112 : vector<1x32xf32> to vector<8x32xf32>
    %134 = arith.addf %132, %133 : vector<8x32xf32>
    %135 = arith.addf %134, %5 : vector<8x32xf32>
    %c0_67 = arith.constant 0 : index
    %c0_68 = arith.constant 0 : index
    %c0_69 = arith.constant 0 : index
    %136 = vector.load %arg13[%c0_67, %c0_68, %c0_69] : memref<1x32x32xf32, #tpu.memory_space<vmem>>, vector<1x32x32xf32>
    %137 = vector.shape_cast %136 : vector<1x32x32xf32> to vector<32x32xf32>
    %cst_70 = arith.constant dense<0.000000e+00> : vector<8x32xf32>
    %138 = tpu.matmul %135, %137, %cst_70 {dimension_numbers = #tpu.dot_dimension_numbers<[1], [0], [0], [1], [0, 0, 1, 1], [], []>} : vector<8x32xf32>, vector<32x32xf32>, vector<8x32xf32> -> vector<8x32xf32>
    %c0_71 = arith.constant 0 : index
    %c0_72 = arith.constant 0 : index
    %c0_73 = arith.constant 0 : index
    %139 = vector.load %arg14[%c0_71, %c0_72, %c0_73] : memref<1x1x32xf32, #tpu.memory_space<vmem>>, vector<1x1x32xf32>
    %140 = vector.shape_cast %139 : vector<1x1x32xf32> to vector<1x32xf32>
    %141 = vector.broadcast %140 : vector<1x32xf32> to vector<8x32xf32>
    %142 = arith.addf %138, %141 : vector<8x32xf32>
    %c0_74 = arith.constant 0 : index
    %c0_75 = arith.constant 0 : index
    %c0_76 = arith.constant 0 : index
    %143 = vector.load %arg15[%c0_74, %c0_75, %c0_76] : memref<1x9x32xf32, #tpu.memory_space<vmem>>, vector<1x9x32xf32>
    %144 = vector.shape_cast %143 : vector<1x9x32xf32> to vector<9x32xf32>
    %cst_77 = arith.constant dense<0.000000e+00> : vector<8x32xf32>
    %145 = tpu.matmul %7, %144, %cst_77 {dimension_numbers = #tpu.dot_dimension_numbers<[1], [0], [0], [1], [0, 0, 1, 1], [], []>} : vector<8x9xf32>, vector<9x32xf32>, vector<8x32xf32> -> vector<8x32xf32>
    %146 = arith.addf %142, %145 : vector<8x32xf32>
    %c0_78 = arith.constant 0 : index
    %c0_79 = arith.constant 0 : index
    %c0_80 = arith.constant 0 : index
    %147 = vector.load %arg16[%c0_78, %c0_79, %c0_80] : memref<1x1x32xf32, #tpu.memory_space<vmem>>, vector<1x1x32xf32>
    %148 = vector.shape_cast %147 : vector<1x1x32xf32> to vector<1x32xf32>
    %149 = vector.broadcast %148 : vector<1x32xf32> to vector<8x32xf32>
    %150 = arith.addf %146, %149 : vector<8x32xf32>
    %c0_81 = arith.constant 0 : index
    %c0_82 = arith.constant 0 : index
    %c0_83 = arith.constant 0 : index
    %151 = vector.load %arg17[%c0_81, %c0_82, %c0_83] : memref<1x32x64xf32, #tpu.memory_space<vmem>>, vector<1x32x64xf32>
    %152 = vector.shape_cast %151 : vector<1x32x64xf32> to vector<32x64xf32>
    %cst_84 = arith.constant dense<0.000000e+00> : vector<84x64xf32>
    %153 = tpu.matmul %9, %152, %cst_84 {dimension_numbers = #tpu.dot_dimension_numbers<[1], [0], [0], [1], [0, 0, 1, 1], [], []>} : vector<84x32xf32>, vector<32x64xf32>, vector<84x64xf32> -> vector<84x64xf32>
    %c0_85 = arith.constant 0 : index
    %c0_86 = arith.constant 0 : index
    %c0_87 = arith.constant 0 : index
    %154 = vector.load %arg18[%c0_85, %c0_86, %c0_87] : memref<1x1x64xf32, #tpu.memory_space<vmem>>, vector<1x1x64xf32>
    %155 = vector.shape_cast %154 : vector<1x1x64xf32> to vector<1x64xf32>
    %156 = vector.broadcast %155 : vector<1x64xf32> to vector<84x64xf32>
    %157 = arith.addf %153, %156 : vector<84x64xf32>
    %158 = vector.extract_strided_slice %157 {offsets = [0, 0], sizes = [84, 32], strides = [1, 1]} : vector<84x64xf32> to vector<84x32xf32>
    %159 = vector.extract_strided_slice %157 {offsets = [0, 32], sizes = [84, 32], strides = [1, 1]} : vector<84x64xf32> to vector<84x32xf32>
    %c0_88 = arith.constant 0 : index
    %c0_89 = arith.constant 0 : index
    %c0_90 = arith.constant 0 : index
    %160 = vector.load %arg19[%c0_88, %c0_89, %c0_90] : memref<1x32x32xf32, #tpu.memory_space<vmem>>, vector<1x32x32xf32>
    %161 = vector.shape_cast %160 : vector<1x32x32xf32> to vector<32x32xf32>
    %c0_91 = arith.constant 0 : index
    %c0_92 = arith.constant 0 : index
    %c0_93 = arith.constant 0 : index
    %162 = vector.load %arg20[%c0_91, %c0_92, %c0_93] : memref<1x1x32xf32, #tpu.memory_space<vmem>>, vector<1x1x32xf32>
    %163 = vector.shape_cast %162 : vector<1x1x32xf32> to vector<1x32xf32>
    %cst_94 = arith.constant 0.000000e+00 : f32
    %164 = vector.broadcast %cst_94 : f32 to vector<8x32xf32>
    %165 = vector.broadcast %163 : vector<1x32xf32> to vector<8x32xf32>
    %166 = arith.addf %164, %165 : vector<8x32xf32>
    %167 = vector.extract_strided_slice %150 {offsets = [0, 0], sizes = [8, 8], strides = [1, 1]} : vector<8x32xf32> to vector<8x8xf32>
    %168 = vector.extract_strided_slice %158 {offsets = [0, 0], sizes = [84, 8], strides = [1, 1]} : vector<84x32xf32> to vector<84x8xf32>
    %169 = vector.extract_strided_slice %159 {offsets = [0, 0], sizes = [84, 8], strides = [1, 1]} : vector<84x32xf32> to vector<84x8xf32>
    %cst_95 = arith.constant dense<0.000000e+00> : vector<8x84xf32>
    %170 = tpu.matmul %167, %168, %cst_95 {dimension_numbers = #tpu.dot_dimension_numbers<[1], [1], [0], [0], [0, 0, 1, 0], [], []>} : vector<8x8xf32>, vector<84x8xf32>, vector<8x84xf32> -> vector<8x84xf32>
    %171 = vector.broadcast %11 : vector<1x84xf32> to vector<8x84xf32>
    %172 = arith.addf %170, %171 : vector<8x84xf32>
    %cst_96 = arith.constant dense<0xFF800000> : vector<8xf32>
    %173 = vector.multi_reduction <maximumf>, %172, %cst_96 [1] : vector<8x84xf32> to vector<8xf32>
    %174 = vector.shape_cast %173 : vector<8xf32> to vector<8x1xf32>
    %175 = vector.broadcast %174 : vector<8x1xf32> to vector<8x84xf32>
    %176 = arith.subf %172, %175 : vector<8x84xf32>
    %177 = math.exp %176 : vector<8x84xf32>
    %cst_97 = arith.constant dense<0.000000e+00> : vector<8xf32>
    %178 = vector.multi_reduction <add>, %177, %cst_97 [1] : vector<8x84xf32> to vector<8xf32>
    %179 = vector.shape_cast %178 : vector<8xf32> to vector<8x1xf32>
    %180 = tpu.reciprocal %179 {approx = true} : vector<8x1xf32> -> vector<8x1xf32>
    %181 = vector.broadcast %180 : vector<8x1xf32> to vector<8x84xf32>
    %182 = arith.mulf %177, %181 : vector<8x84xf32>
    %cst_98 = arith.constant dense<0.000000e+00> : vector<8x8xf32>
    %183 = tpu.matmul %182, %169, %cst_98 {dimension_numbers = #tpu.dot_dimension_numbers<[1], [0], [0], [1], [0, 0, 1, 1], [], []>} : vector<8x84xf32>, vector<84x8xf32>, vector<8x8xf32> -> vector<8x8xf32>
    %184 = vector.extract_strided_slice %161 {offsets = [0, 0], sizes = [8, 32], strides = [1, 1]} : vector<32x32xf32> to vector<8x32xf32>
    %cst_99 = arith.constant dense<0.000000e+00> : vector<8x32xf32>
    %185 = tpu.matmul %183, %184, %cst_99 {dimension_numbers = #tpu.dot_dimension_numbers<[1], [0], [0], [1], [0, 0, 1, 1], [], []>} : vector<8x8xf32>, vector<8x32xf32>, vector<8x32xf32> -> vector<8x32xf32>
    %186 = arith.addf %166, %185 : vector<8x32xf32>
    %187 = vector.extract_strided_slice %150 {offsets = [0, 8], sizes = [8, 8], strides = [1, 1]} : vector<8x32xf32> to vector<8x8xf32>
    %188 = vector.extract_strided_slice %158 {offsets = [0, 8], sizes = [84, 8], strides = [1, 1]} : vector<84x32xf32> to vector<84x8xf32>
    %189 = vector.extract_strided_slice %159 {offsets = [0, 8], sizes = [84, 8], strides = [1, 1]} : vector<84x32xf32> to vector<84x8xf32>
    %cst_100 = arith.constant dense<0.000000e+00> : vector<8x84xf32>
    %190 = tpu.matmul %187, %188, %cst_100 {dimension_numbers = #tpu.dot_dimension_numbers<[1], [1], [0], [0], [0, 0, 1, 0], [], []>} : vector<8x8xf32>, vector<84x8xf32>, vector<8x84xf32> -> vector<8x84xf32>
    %191 = vector.broadcast %11 : vector<1x84xf32> to vector<8x84xf32>
    %192 = arith.addf %190, %191 : vector<8x84xf32>
    %cst_101 = arith.constant dense<0xFF800000> : vector<8xf32>
    %193 = vector.multi_reduction <maximumf>, %192, %cst_101 [1] : vector<8x84xf32> to vector<8xf32>
    %194 = vector.shape_cast %193 : vector<8xf32> to vector<8x1xf32>
    %195 = vector.broadcast %194 : vector<8x1xf32> to vector<8x84xf32>
    %196 = arith.subf %192, %195 : vector<8x84xf32>
    %197 = math.exp %196 : vector<8x84xf32>
    %cst_102 = arith.constant dense<0.000000e+00> : vector<8xf32>
    %198 = vector.multi_reduction <add>, %197, %cst_102 [1] : vector<8x84xf32> to vector<8xf32>
    %199 = vector.shape_cast %198 : vector<8xf32> to vector<8x1xf32>
    %200 = tpu.reciprocal %199 {approx = true} : vector<8x1xf32> -> vector<8x1xf32>
    %201 = vector.broadcast %200 : vector<8x1xf32> to vector<8x84xf32>
    %202 = arith.mulf %197, %201 : vector<8x84xf32>
    %cst_103 = arith.constant dense<0.000000e+00> : vector<8x8xf32>
    %203 = tpu.matmul %202, %189, %cst_103 {dimension_numbers = #tpu.dot_dimension_numbers<[1], [0], [0], [1], [0, 0, 1, 1], [], []>} : vector<8x84xf32>, vector<84x8xf32>, vector<8x8xf32> -> vector<8x8xf32>
    %204 = vector.extract_strided_slice %161 {offsets = [8, 0], sizes = [8, 32], strides = [1, 1]} : vector<32x32xf32> to vector<8x32xf32>
    %cst_104 = arith.constant dense<0.000000e+00> : vector<8x32xf32>
    %205 = tpu.matmul %203, %204, %cst_104 {dimension_numbers = #tpu.dot_dimension_numbers<[1], [0], [0], [1], [0, 0, 1, 1], [], []>} : vector<8x8xf32>, vector<8x32xf32>, vector<8x32xf32> -> vector<8x32xf32>
    %206 = arith.addf %186, %205 : vector<8x32xf32>
    %207 = vector.extract_strided_slice %150 {offsets = [0, 16], sizes = [8, 8], strides = [1, 1]} : vector<8x32xf32> to vector<8x8xf32>
    %208 = vector.extract_strided_slice %158 {offsets = [0, 16], sizes = [84, 8], strides = [1, 1]} : vector<84x32xf32> to vector<84x8xf32>
    %209 = vector.extract_strided_slice %159 {offsets = [0, 16], sizes = [84, 8], strides = [1, 1]} : vector<84x32xf32> to vector<84x8xf32>
    %cst_105 = arith.constant dense<0.000000e+00> : vector<8x84xf32>
    %210 = tpu.matmul %207, %208, %cst_105 {dimension_numbers = #tpu.dot_dimension_numbers<[1], [1], [0], [0], [0, 0, 1, 0], [], []>} : vector<8x8xf32>, vector<84x8xf32>, vector<8x84xf32> -> vector<8x84xf32>
    %211 = vector.broadcast %11 : vector<1x84xf32> to vector<8x84xf32>
    %212 = arith.addf %210, %211 : vector<8x84xf32>
    %cst_106 = arith.constant dense<0xFF800000> : vector<8xf32>
    %213 = vector.multi_reduction <maximumf>, %212, %cst_106 [1] : vector<8x84xf32> to vector<8xf32>
    %214 = vector.shape_cast %213 : vector<8xf32> to vector<8x1xf32>
    %215 = vector.broadcast %214 : vector<8x1xf32> to vector<8x84xf32>
    %216 = arith.subf %212, %215 : vector<8x84xf32>
    %217 = math.exp %216 : vector<8x84xf32>
    %cst_107 = arith.constant dense<0.000000e+00> : vector<8xf32>
    %218 = vector.multi_reduction <add>, %217, %cst_107 [1] : vector<8x84xf32> to vector<8xf32>
    %219 = vector.shape_cast %218 : vector<8xf32> to vector<8x1xf32>
    %220 = tpu.reciprocal %219 {approx = true} : vector<8x1xf32> -> vector<8x1xf32>
    %221 = vector.broadcast %220 : vector<8x1xf32> to vector<8x84xf32>
    %222 = arith.mulf %217, %221 : vector<8x84xf32>
    %cst_108 = arith.constant dense<0.000000e+00> : vector<8x8xf32>
    %223 = tpu.matmul %222, %209, %cst_108 {dimension_numbers = #tpu.dot_dimension_numbers<[1], [0], [0], [1], [0, 0, 1, 1], [], []>} : vector<8x84xf32>, vector<84x8xf32>, vector<8x8xf32> -> vector<8x8xf32>
    %224 = vector.extract_strided_slice %161 {offsets = [16, 0], sizes = [8, 32], strides = [1, 1]} : vector<32x32xf32> to vector<8x32xf32>
    %cst_109 = arith.constant dense<0.000000e+00> : vector<8x32xf32>
    %225 = tpu.matmul %223, %224, %cst_109 {dimension_numbers = #tpu.dot_dimension_numbers<[1], [0], [0], [1], [0, 0, 1, 1], [], []>} : vector<8x8xf32>, vector<8x32xf32>, vector<8x32xf32> -> vector<8x32xf32>
    %226 = arith.addf %206, %225 : vector<8x32xf32>
    %227 = vector.extract_strided_slice %150 {offsets = [0, 24], sizes = [8, 8], strides = [1, 1]} : vector<8x32xf32> to vector<8x8xf32>
    %228 = vector.extract_strided_slice %158 {offsets = [0, 24], sizes = [84, 8], strides = [1, 1]} : vector<84x32xf32> to vector<84x8xf32>
    %229 = vector.extract_strided_slice %159 {offsets = [0, 24], sizes = [84, 8], strides = [1, 1]} : vector<84x32xf32> to vector<84x8xf32>
    %cst_110 = arith.constant dense<0.000000e+00> : vector<8x84xf32>
    %230 = tpu.matmul %227, %228, %cst_110 {dimension_numbers = #tpu.dot_dimension_numbers<[1], [1], [0], [0], [0, 0, 1, 0], [], []>} : vector<8x8xf32>, vector<84x8xf32>, vector<8x84xf32> -> vector<8x84xf32>
    %231 = vector.broadcast %11 : vector<1x84xf32> to vector<8x84xf32>
    %232 = arith.addf %230, %231 : vector<8x84xf32>
    %cst_111 = arith.constant dense<0xFF800000> : vector<8xf32>
    %233 = vector.multi_reduction <maximumf>, %232, %cst_111 [1] : vector<8x84xf32> to vector<8xf32>
    %234 = vector.shape_cast %233 : vector<8xf32> to vector<8x1xf32>
    %235 = vector.broadcast %234 : vector<8x1xf32> to vector<8x84xf32>
    %236 = arith.subf %232, %235 : vector<8x84xf32>
    %237 = math.exp %236 : vector<8x84xf32>
    %cst_112 = arith.constant dense<0.000000e+00> : vector<8xf32>
    %238 = vector.multi_reduction <add>, %237, %cst_112 [1] : vector<8x84xf32> to vector<8xf32>
    %239 = vector.shape_cast %238 : vector<8xf32> to vector<8x1xf32>
    %240 = tpu.reciprocal %239 {approx = true} : vector<8x1xf32> -> vector<8x1xf32>
    %241 = vector.broadcast %240 : vector<8x1xf32> to vector<8x84xf32>
    %242 = arith.mulf %237, %241 : vector<8x84xf32>
    %cst_113 = arith.constant dense<0.000000e+00> : vector<8x8xf32>
    %243 = tpu.matmul %242, %229, %cst_113 {dimension_numbers = #tpu.dot_dimension_numbers<[1], [0], [0], [1], [0, 0, 1, 1], [], []>} : vector<8x84xf32>, vector<84x8xf32>, vector<8x8xf32> -> vector<8x8xf32>
    %244 = vector.extract_strided_slice %161 {offsets = [24, 0], sizes = [8, 32], strides = [1, 1]} : vector<32x32xf32> to vector<8x32xf32>
    %cst_114 = arith.constant dense<0.000000e+00> : vector<8x32xf32>
    %245 = tpu.matmul %243, %244, %cst_114 {dimension_numbers = #tpu.dot_dimension_numbers<[1], [0], [0], [1], [0, 0, 1, 1], [], []>} : vector<8x8xf32>, vector<8x32xf32>, vector<8x32xf32> -> vector<8x32xf32>
    %246 = arith.addf %226, %245 : vector<8x32xf32>
    %247 = arith.addf %134, %246 : vector<8x32xf32>
    %c0_115 = arith.constant 0 : index
    %c1 = arith.constant 1 : index
    %c0_116 = arith.constant 0 : index
    %c0_117 = arith.constant 0 : index
    %248 = vector.load %arg25[%c0_115, %c1, %c0_116, %c0_117] : memref<1x3x1x32xf32, #tpu.memory_space<vmem>>, vector<1x1x1x32xf32>
    %249 = vector.shape_cast %248 : vector<1x1x1x32xf32> to vector<1x32xf32>
    %c0_118 = arith.constant 0 : index
    %c1_119 = arith.constant 1 : index
    %c0_120 = arith.constant 0 : index
    %c0_121 = arith.constant 0 : index
    %250 = vector.load %arg26[%c0_118, %c1_119, %c0_120, %c0_121] : memref<1x3x1x32xf32, #tpu.memory_space<vmem>>, vector<1x1x1x32xf32>
    %251 = vector.shape_cast %250 : vector<1x1x1x32xf32> to vector<1x32xf32>
    %cst_122 = arith.constant dense<0.000000e+00> : vector<8xf32>
    %252 = vector.multi_reduction <add>, %247, %cst_122 [1] : vector<8x32xf32> to vector<8xf32>
    %253 = vector.shape_cast %252 : vector<8xf32> to vector<8x1xf32>
    %cst_123 = arith.constant 3.200000e+01 : f32
    %254 = vector.broadcast %cst_123 : f32 to vector<8x1xf32>
    %255 = arith.divf %253, %254 : vector<8x1xf32>
    %256 = vector.broadcast %255 : vector<8x1xf32> to vector<8x32xf32>
    %257 = arith.subf %247, %256 : vector<8x32xf32>
    %258 = arith.mulf %257, %257 : vector<8x32xf32>
    %cst_124 = arith.constant dense<0.000000e+00> : vector<8xf32>
    %259 = vector.multi_reduction <add>, %258, %cst_124 [1] : vector<8x32xf32> to vector<8xf32>
    %260 = vector.shape_cast %259 : vector<8xf32> to vector<8x1xf32>
    %cst_125 = arith.constant 3.200000e+01 : f32
    %261 = vector.broadcast %cst_125 : f32 to vector<8x1xf32>
    %262 = arith.divf %260, %261 : vector<8x1xf32>
    %263 = vector.broadcast %255 : vector<8x1xf32> to vector<8x32xf32>
    %264 = arith.subf %247, %263 : vector<8x32xf32>
    %cst_126 = arith.constant 9.99999974E-6 : f32
    %265 = vector.broadcast %cst_126 : f32 to vector<8x1xf32>
    %266 = arith.addf %262, %265 : vector<8x1xf32>
    %267 = math.rsqrt %266 : vector<8x1xf32>
    %268 = vector.broadcast %267 : vector<8x1xf32> to vector<8x32xf32>
    %269 = arith.mulf %264, %268 : vector<8x32xf32>
    %270 = vector.broadcast %249 : vector<1x32xf32> to vector<8x32xf32>
    %271 = arith.mulf %269, %270 : vector<8x32xf32>
    %272 = vector.broadcast %251 : vector<1x32xf32> to vector<8x32xf32>
    %273 = arith.addf %271, %272 : vector<8x32xf32>
    %c0_127 = arith.constant 0 : index
    %c0_128 = arith.constant 0 : index
    %c0_129 = arith.constant 0 : index
    %274 = vector.load %arg21[%c0_127, %c0_128, %c0_129] : memref<1x32x64xf32, #tpu.memory_space<vmem>>, vector<1x32x64xf32>
    %275 = vector.shape_cast %274 : vector<1x32x64xf32> to vector<32x64xf32>
    %cst_130 = arith.constant dense<0.000000e+00> : vector<8x64xf32>
    %276 = tpu.matmul %273, %275, %cst_130 {dimension_numbers = #tpu.dot_dimension_numbers<[1], [0], [0], [1], [0, 0, 1, 1], [], []>} : vector<8x32xf32>, vector<32x64xf32>, vector<8x64xf32> -> vector<8x64xf32>
    %c0_131 = arith.constant 0 : index
    %c0_132 = arith.constant 0 : index
    %c0_133 = arith.constant 0 : index
    %277 = vector.load %arg22[%c0_131, %c0_132, %c0_133] : memref<1x1x64xf32, #tpu.memory_space<vmem>>, vector<1x1x64xf32>
    %278 = vector.shape_cast %277 : vector<1x1x64xf32> to vector<1x64xf32>
    %279 = vector.broadcast %278 : vector<1x64xf32> to vector<8x64xf32>
    %280 = arith.addf %276, %279 : vector<8x64xf32>
    %cst_134 = arith.constant 0.000000e+00 : f32
    %281 = vector.broadcast %cst_134 : f32 to vector<8x64xf32>
    %282 = arith.maximumf %280, %281 : vector<8x64xf32>
    %c0_135 = arith.constant 0 : index
    %c0_136 = arith.constant 0 : index
    %c0_137 = arith.constant 0 : index
    %283 = vector.load %arg23[%c0_135, %c0_136, %c0_137] : memref<1x64x32xf32, #tpu.memory_space<vmem>>, vector<1x64x32xf32>
    %284 = vector.shape_cast %283 : vector<1x64x32xf32> to vector<64x32xf32>
    %cst_138 = arith.constant dense<0.000000e+00> : vector<8x32xf32>
    %285 = tpu.matmul %282, %284, %cst_138 {dimension_numbers = #tpu.dot_dimension_numbers<[1], [0], [0], [1], [0, 0, 1, 1], [], []>} : vector<8x64xf32>, vector<64x32xf32>, vector<8x32xf32> -> vector<8x32xf32>
    %c0_139 = arith.constant 0 : index
    %c0_140 = arith.constant 0 : index
    %c0_141 = arith.constant 0 : index
    %286 = vector.load %arg24[%c0_139, %c0_140, %c0_141] : memref<1x1x32xf32, #tpu.memory_space<vmem>>, vector<1x1x32xf32>
    %287 = vector.shape_cast %286 : vector<1x1x32xf32> to vector<1x32xf32>
    %288 = vector.broadcast %287 : vector<1x32xf32> to vector<8x32xf32>
    %289 = arith.addf %285, %288 : vector<8x32xf32>
    %290 = arith.addf %273, %289 : vector<8x32xf32>
    %c0_142 = arith.constant 0 : index
    %c2 = arith.constant 2 : index
    %c0_143 = arith.constant 0 : index
    %c0_144 = arith.constant 0 : index
    %291 = vector.load %arg25[%c0_142, %c2, %c0_143, %c0_144] : memref<1x3x1x32xf32, #tpu.memory_space<vmem>>, vector<1x1x1x32xf32>
    %292 = vector.shape_cast %291 : vector<1x1x1x32xf32> to vector<1x32xf32>
    %c0_145 = arith.constant 0 : index
    %c2_146 = arith.constant 2 : index
    %c0_147 = arith.constant 0 : index
    %c0_148 = arith.constant 0 : index
    %293 = vector.load %arg26[%c0_145, %c2_146, %c0_147, %c0_148] : memref<1x3x1x32xf32, #tpu.memory_space<vmem>>, vector<1x1x1x32xf32>
    %294 = vector.shape_cast %293 : vector<1x1x1x32xf32> to vector<1x32xf32>
    %cst_149 = arith.constant dense<0.000000e+00> : vector<8xf32>
    %295 = vector.multi_reduction <add>, %290, %cst_149 [1] : vector<8x32xf32> to vector<8xf32>
    %296 = vector.shape_cast %295 : vector<8xf32> to vector<8x1xf32>
    %cst_150 = arith.constant 3.200000e+01 : f32
    %297 = vector.broadcast %cst_150 : f32 to vector<8x1xf32>
    %298 = arith.divf %296, %297 : vector<8x1xf32>
    %299 = vector.broadcast %298 : vector<8x1xf32> to vector<8x32xf32>
    %300 = arith.subf %290, %299 : vector<8x32xf32>
    %301 = arith.mulf %300, %300 : vector<8x32xf32>
    %cst_151 = arith.constant dense<0.000000e+00> : vector<8xf32>
    %302 = vector.multi_reduction <add>, %301, %cst_151 [1] : vector<8x32xf32> to vector<8xf32>
    %303 = vector.shape_cast %302 : vector<8xf32> to vector<8x1xf32>
    %cst_152 = arith.constant 3.200000e+01 : f32
    %304 = vector.broadcast %cst_152 : f32 to vector<8x1xf32>
    %305 = arith.divf %303, %304 : vector<8x1xf32>
    %306 = vector.broadcast %298 : vector<8x1xf32> to vector<8x32xf32>
    %307 = arith.subf %290, %306 : vector<8x32xf32>
    %cst_153 = arith.constant 9.99999974E-6 : f32
    %308 = vector.broadcast %cst_153 : f32 to vector<8x1xf32>
    %309 = arith.addf %305, %308 : vector<8x1xf32>
    %310 = math.rsqrt %309 : vector<8x1xf32>
    %311 = vector.broadcast %310 : vector<8x1xf32> to vector<8x32xf32>
    %312 = arith.mulf %307, %311 : vector<8x32xf32>
    %313 = vector.broadcast %292 : vector<1x32xf32> to vector<8x32xf32>
    %314 = arith.mulf %312, %313 : vector<8x32xf32>
    %315 = vector.broadcast %294 : vector<1x32xf32> to vector<8x32xf32>
    %316 = arith.addf %314, %315 : vector<8x32xf32>
    %c0_154 = arith.constant 0 : index
    %c0_155 = arith.constant 0 : index
    %317 = vector.load %arg28[%c0_154, %c0_155] : memref<8x32xf32, #tpu.memory_space<vmem>>, vector<8x32xf32>
    tpu.vector_store %arg28[%c0_154, %c0_155], %316 {strides = array<i32>} : memref<8x32xf32, #tpu.memory_space<vmem>>, vector<8x32xf32>,
    %c0_156 = arith.constant 0 : index
    %c0_157 = arith.constant 0 : index
    %c0_158 = arith.constant 0 : index
    %c0_159 = arith.constant 0 : index
    %318 = vector.load %arg27[%c0_156, %c0_157, %c0_158, %c0_159] : memref<1x1x8x32xf32, #tpu.memory_space<vmem>>, vector<1x1x8x32xf32>
    %319 = vector.shape_cast %318 : vector<1x1x8x32xf32> to vector<8x32xf32>
    %320 = vector.shape_cast %316 : vector<8x32xf32> to vector<1x1x8x32xf32>
    tpu.vector_store %arg27[%c0_156, %c0_157, %c0_158, %c0_159], %320 {strides = array<i32>} : memref<1x1x8x32xf32, #tpu.memory_space<vmem>>, vector<1x1x8x32xf32>,
    return
  }
  func.func @transform_0(%arg0: i32, %arg1: i32) -> (i32, i32, i32) {
    %c0_i32 = arith.constant 0 : i32
    %c0_i32_0 = arith.constant 0 : i32
    %c0_i32_1 = arith.constant 0 : i32
    return %arg0, %c0_i32, %c0_i32_0 : i32, i32, i32
  }
  func.func @transform_1(%arg0: i32, %arg1: i32) -> (i32, i32, i32) {
    %c0_i32 = arith.constant 0 : i32
    %c0_i32_0 = arith.constant 0 : i32
    %c0_i32_1 = arith.constant 0 : i32
    return %arg0, %c0_i32, %c0_i32_0 : i32, i32, i32
  }
  func.func @transform_2(%arg0: i32, %arg1: i32) -> (i32, i32, i32) {
    %c0_i32 = arith.constant 0 : i32
    %c0_i32_0 = arith.constant 0 : i32
    %c0_i32_1 = arith.constant 0 : i32
    return %arg0, %c0_i32, %c0_i32_0 : i32, i32, i32
  }
  func.func @transform_3(%arg0: i32, %arg1: i32) -> (i32, i32, i32) {
    %c0_i32 = arith.constant 0 : i32
    %c0_i32_0 = arith.constant 0 : i32
    %c0_i32_1 = arith.constant 0 : i32
    return %arg0, %c0_i32, %c0_i32_0 : i32, i32, i32
  }
  func.func @transform_4(%arg0: i32, %arg1: i32) -> (i32, i32, i32) {
    %c0_i32 = arith.constant 0 : i32
    %c0_i32_0 = arith.constant 0 : i32
    %c0_i32_1 = arith.constant 0 : i32
    return %arg0, %c0_i32, %c0_i32_0 : i32, i32, i32
  }
  func.func @transform_5(%arg0: i32, %arg1: i32) -> (i32, i32, i32) {
    %c0_i32 = arith.constant 0 : i32
    %c0_i32_0 = arith.constant 0 : i32
    %c0_i32_1 = arith.constant 0 : i32
    return %arg1, %c0_i32, %c0_i32_0 : i32, i32, i32
  }
  func.func @transform_6(%arg0: i32, %arg1: i32) -> (i32, i32, i32) {
    %c0_i32 = arith.constant 0 : i32
    %c0_i32_0 = arith.constant 0 : i32
    %c0_i32_1 = arith.constant 0 : i32
    return %arg1, %c0_i32, %c0_i32_0 : i32, i32, i32
  }
  func.func @transform_7(%arg0: i32, %arg1: i32) -> (i32, i32, i32) {
    %c0_i32 = arith.constant 0 : i32
    %c0_i32_0 = arith.constant 0 : i32
    %c0_i32_1 = arith.constant 0 : i32
    return %arg1, %c0_i32, %c0_i32_0 : i32, i32, i32
  }
  func.func @transform_8(%arg0: i32, %arg1: i32) -> (i32, i32, i32) {
    %c0_i32 = arith.constant 0 : i32
    %c0_i32_0 = arith.constant 0 : i32
    %c0_i32_1 = arith.constant 0 : i32
    return %arg1, %c0_i32, %c0_i32_0 : i32, i32, i32
  }
  func.func @transform_9(%arg0: i32, %arg1: i32) -> (i32, i32, i32) {
    %c0_i32 = arith.constant 0 : i32
    %c0_i32_0 = arith.constant 0 : i32
    %c0_i32_1 = arith.constant 0 : i32
    return %arg1, %c0_i32, %c0_i32_0 : i32, i32, i32
  }
  func.func @transform_10(%arg0: i32, %arg1: i32) -> (i32, i32, i32) {
    %c0_i32 = arith.constant 0 : i32
    %c0_i32_0 = arith.constant 0 : i32
    %c0_i32_1 = arith.constant 0 : i32
    return %arg1, %c0_i32, %c0_i32_0 : i32, i32, i32
  }
  func.func @transform_11(%arg0: i32, %arg1: i32) -> (i32, i32, i32) {
    %c0_i32 = arith.constant 0 : i32
    %c0_i32_0 = arith.constant 0 : i32
    %c0_i32_1 = arith.constant 0 : i32
    return %arg1, %c0_i32, %c0_i32_0 : i32, i32, i32
  }
  func.func @transform_12(%arg0: i32, %arg1: i32) -> (i32, i32, i32) {
    %c0_i32 = arith.constant 0 : i32
    %c0_i32_0 = arith.constant 0 : i32
    %c0_i32_1 = arith.constant 0 : i32
    return %arg1, %c0_i32, %c0_i32_0 : i32, i32, i32
  }
  func.func @transform_13(%arg0: i32, %arg1: i32) -> (i32, i32, i32) {
    %c0_i32 = arith.constant 0 : i32
    %c0_i32_0 = arith.constant 0 : i32
    %c0_i32_1 = arith.constant 0 : i32
    return %arg1, %c0_i32, %c0_i32_0 : i32, i32, i32
  }
  func.func @transform_14(%arg0: i32, %arg1: i32) -> (i32, i32, i32) {
    %c0_i32 = arith.constant 0 : i32
    %c0_i32_0 = arith.constant 0 : i32
    %c0_i32_1 = arith.constant 0 : i32
    return %arg1, %c0_i32, %c0_i32_0 : i32, i32, i32
  }
  func.func @transform_15(%arg0: i32, %arg1: i32) -> (i32, i32, i32) {
    %c0_i32 = arith.constant 0 : i32
    %c0_i32_0 = arith.constant 0 : i32
    %c0_i32_1 = arith.constant 0 : i32
    return %arg1, %c0_i32, %c0_i32_0 : i32, i32, i32
  }
  func.func @transform_16(%arg0: i32, %arg1: i32) -> (i32, i32, i32) {
    %c0_i32 = arith.constant 0 : i32
    %c0_i32_0 = arith.constant 0 : i32
    %c0_i32_1 = arith.constant 0 : i32
    return %arg1, %c0_i32, %c0_i32_0 : i32, i32, i32
  }
  func.func @transform_17(%arg0: i32, %arg1: i32) -> (i32, i32, i32) {
    %c0_i32 = arith.constant 0 : i32
    %c0_i32_0 = arith.constant 0 : i32
    %c0_i32_1 = arith.constant 0 : i32
    return %arg1, %c0_i32, %c0_i32_0 : i32, i32, i32
  }
  func.func @transform_18(%arg0: i32, %arg1: i32) -> (i32, i32, i32) {
    %c0_i32 = arith.constant 0 : i32
    %c0_i32_0 = arith.constant 0 : i32
    %c0_i32_1 = arith.constant 0 : i32
    return %arg1, %c0_i32, %c0_i32_0 : i32, i32, i32
  }
  func.func @transform_19(%arg0: i32, %arg1: i32) -> (i32, i32, i32) {
    %c0_i32 = arith.constant 0 : i32
    %c0_i32_0 = arith.constant 0 : i32
    %c0_i32_1 = arith.constant 0 : i32
    return %arg1, %c0_i32, %c0_i32_0 : i32, i32, i32
  }
  func.func @transform_20(%arg0: i32, %arg1: i32) -> (i32, i32, i32) {
    %c0_i32 = arith.constant 0 : i32
    %c0_i32_0 = arith.constant 0 : i32
    %c0_i32_1 = arith.constant 0 : i32
    return %arg1, %c0_i32, %c0_i32_0 : i32, i32, i32
  }
  func.func @transform_21(%arg0: i32, %arg1: i32) -> (i32, i32, i32) {
    %c0_i32 = arith.constant 0 : i32
    %c0_i32_0 = arith.constant 0 : i32
    %c0_i32_1 = arith.constant 0 : i32
    return %arg1, %c0_i32, %c0_i32_0 : i32, i32, i32
  }
  func.func @transform_22(%arg0: i32, %arg1: i32) -> (i32, i32, i32) {
    %c0_i32 = arith.constant 0 : i32
    %c0_i32_0 = arith.constant 0 : i32
    %c0_i32_1 = arith.constant 0 : i32
    return %arg1, %c0_i32, %c0_i32_0 : i32, i32, i32
  }
  func.func @transform_23(%arg0: i32, %arg1: i32) -> (i32, i32, i32, i32) {
    %c0_i32 = arith.constant 0 : i32
    %c0_i32_0 = arith.constant 0 : i32
    %c0_i32_1 = arith.constant 0 : i32
    %c0_i32_2 = arith.constant 0 : i32
    return %arg1, %c0_i32, %c0_i32_0, %c0_i32_1 : i32, i32, i32, i32
  }
  func.func @transform_24(%arg0: i32, %arg1: i32) -> (i32, i32, i32, i32) {
    %c0_i32 = arith.constant 0 : i32
    %c0_i32_0 = arith.constant 0 : i32
    %c0_i32_1 = arith.constant 0 : i32
    %c0_i32_2 = arith.constant 0 : i32
    return %arg1, %c0_i32, %c0_i32_0, %c0_i32_1 : i32, i32, i32, i32
  }
  func.func @transform_25(%arg0: i32, %arg1: i32) -> (i32, i32, i32, i32) {
    %c0_i32 = arith.constant 0 : i32
    %c0_i32_0 = arith.constant 0 : i32
    %c0_i32_1 = arith.constant 0 : i32
    return %arg1, %arg0, %c0_i32, %c0_i32_0 : i32, i32, i32, i32
  }
}

</mosaic_0001>

<bundles_post_ra>
// kernel: deformable_transformer_decoder.1
= control target key start
LH: loop header
LB: loop body
LE: loop exit
PB: predicated region body
PF: predicated region fallthrough
CT: control target
= control target key end

     0   :  { %s4289_s0 = inlined_call_operand.vmem [shape: f32[2,8,32], index: 0, kind: input, shape index: {}]   ;;  %s4290_s1 = inlined_call_operand.vmem [shape: f32[2,8,32], index: 1, kind: input, shape index: {}]   ;;  %s4291_s2 = inlined_call_operand.vmem [shape: f32[2,8,9], index: 2, kind: input, shape index: {}]   ;;  %s4292_s3 = inlined_call_operand.vmem [shape: f32[2,84,32], index: 3, kind: input, shape index: {}]   ;;  %s4293_s4 = inlined_call_operand.vmem [shape: f32[2,1,84], index: 4, kind: input, shape index: {}]   ;;  %s4294_s5 = inlined_call_operand.vmem [shape: f32[3,32,64], index: 5, kind: input, shape index: {}]   ;;  %s4295_s6 = inlined_call_operand.vmem [shape: f32[3,1,64], index: 6, kind: input, shape index: {}]   ;;  %s4296_s7 = inlined_call_operand.vmem [shape: f32[3,32,32], index: 7, kind: input, shape index: {}]   ;;  %s4297_s8 = inlined_call_operand.vmem [shape: f32[3,1,32], index: 8, kind: input, shape index: {}]   ;;  %s4298_s9 = inlined_call_operand.vmem [shape: f32[3,32,32], index: 9, kind: input, shape index: {}]   ;;  %s4299_s10 = inlined_call_operand.vmem [shape: f32[3,1,32], index: 10, kind: input, shape index: {}]   ;;  %s4300_s11 = inlined_call_operand.vmem [shape: f32[3,32,32], index: 11, kind: input, shape index: {}]   ;;  %s4301_s12 = inlined_call_operand.vmem [shape: f32[3,1,32], index: 12, kind: input, shape index: {}]   ;;  %s4302_s13 = inlined_call_operand.vmem [shape: f32[3,9,32], index: 13, kind: input, shape index: {}]   ;;  %s4303_s14 = inlined_call_operand.vmem [shape: f32[3,1,32], index: 14, kind: input, shape index: {}]   ;;  %s4304_s15 = inlined_call_operand.vmem [shape: f32[3,32,64], index: 15, kind: input, shape index: {}]   ;;  %s4305_s16 = inlined_call_operand.vmem [shape: f32[3,1,64], index: 16, kind: input, shape index: {}]   ;;  %s4306_s17 = inlined_call_operand.vmem [shape: f32[3,32,32], index: 17, kind: input, shape index: {}]   ;;  %s4307_s18 = inlined_call_operand.vmem [shape: f32[3,1,32], index: 18, kind: input, shape index: {}]   ;;  %s4308_s19 = inlined_call_operand.vmem [shape: f32[3,32,64], index: 19, kind: input, shape index: {}]   ;;  %s4309_s20 = inlined_call_operand.vmem [shape: f32[3,1,64], index: 20, kind: input, shape index: {}]   ;;  %s4310_s21 = inlined_call_operand.vmem [shape: f32[3,64,32], index: 21, kind: input, shape index: {}]   ;;  %s4311_s22 = inlined_call_operand.vmem [shape: f32[3,1,32], index: 22, kind: input, shape index: {}]   ;;  %s4312_s23 = inlined_call_operand.vmem [shape: f32[3,3,1,32], index: 23, kind: input, shape index: {}]   ;;  %s4313_s24 = inlined_call_operand.vmem [shape: f32[3,3,1,32], index: 24, kind: input, shape index: {}]   ;;  %s4314_s25 = inlined_call_operand.hbm [shape: f32[3,2,8,32], index: 25, kind: output, shape index: {}]  }
   0x1   :  { %4335 = sst [smem:[#allocation23_spill]] %s4289_s0 }
   0x2   :  { %4336 = sst [smem:[#allocation24_spill]] %s4290_s1 }
   0x3   :  { %4337 = sst [smem:[#allocation25_spill]] %s4291_s2 }
   0x4   :  { %4338 = sst [smem:[#allocation26_spill]] %s4292_s3 }
   0x5   :  { %4339 = sst [smem:[#allocation27_spill]] %s4293_s4 }
   0x6   :  { %4340 = sst [smem:[#allocation28_spill]] %s4294_s5 }
   0x7   :  { %4341 = sst [smem:[#allocation29_spill]] %s4295_s6 }
   0x8   :  { %4342 = sst [smem:[#allocation30_spill]] %s4296_s7 }
   0x9   :  { %4343 = sst [smem:[#allocation31_spill]] %s4297_s8 }
   0xa   :  { %4344 = sst [smem:[#allocation32_spill]] %s4298_s9 }
   0xb   :  { %4345 = sst [smem:[#allocation33_spill]] %s4300_s11 }
   0xc   :  { %4346 = sst [smem:[#allocation34_spill]] %s4301_s12 }
   0xd   :  { %4347 = sst [smem:[#allocation35_spill]] %s4302_s13 }
   0xe   :  { %4348 = sst [smem:[#allocation36_spill]] %s4303_s14 }
   0xf   :  { %4349 = sst [smem:[#allocation37_spill]] %s4304_s15 }
  0x10   :  { %4350 = sst [smem:[#allocation38_spill]] %s4306_s17 }
  0x11   :  { %4351 = sst [smem:[#allocation39_spill]] %s4307_s18 }
  0x12   :  { %4352 = sst [smem:[#allocation40_spill]] %s4308_s19 }
  0x13   :  { %4353 = sst [smem:[#allocation41_spill]] %s4309_s20 }
  0x14   :  { %4354 = sst [smem:[#allocation42_spill]] %s4310_s21 }
  0x15   :  { %4355 = sst [smem:[#allocation43_spill]] %s4311_s22 }
  0x16   :  { %4356 = sst [smem:[#allocation44_spill]] %s4312_s23 }
  0x17   :  { %4357 = sst [smem:[#allocation45_spill]] %s4313_s24 }
  0x18   :  { %4358 = sst [smem:[#allocation46_spill]] %s4314_s25 }
  0x19   :  { %30 = vsyncpa [#allocation4], 0 }
  0x1a   :  { %32 = vsyncpa [#allocation4 + $0x1], 0  ;;  %s3572_s29 = smov 0   ;;  %s3574_s2 = smov 0  }
  0x1b   :  { %s3576_s6 = smov 0   ;;  %s3578_s30 = smov 0  }
  0x1c   :  { %s3580_s7 = smov 0   ;;  %s3582_s3 = smov 0  }
  0x1d   :  { %s3584_s26 = smov 0   ;;  %s3586_s1 = smov 0  }
  0x1e LB: > { %4359 = sst [smem:[#allocation6_spill]] %s3404_s29  ;;  %s2960_s8 = sadd.s32 4294967295, %s3432_s1   ;;  %s3432_s1 = sphi %s3586_s1, %s38_s1   ;;  %s3428_s26 = sphi %s3584_s26, %s4444_s26   ;;  %s3424_s3 = sphi %s3582_s3, %s4443_s3   ;;  %s3420_s7 = sphi %s3580_s7, %s4442_s7   ;;  %s3416_s30 = sphi %s3578_s30, %s4441_s30   ;;  %s3412_s6 = sphi %s3576_s6, %s4440_s6   ;;  %s3408_s2 = sphi %s3574_s2, %s4439_s2   ;;  %s3404_s29 = sphi %s3572_s29, %s4438_s29  }
  0x1f   : > { %4360 = sst [smem:[#allocation7_spill]] %s3408_s2  ;;  %s2961_s27 = sadd.s32 4294967294, %s3432_s1  }
  0x20   : > { %4361 = sst [smem:[#allocation8_spill]] %s3412_s6  ;;  %s47_s4 = sadd.s32 1, %s3424_s3 }
  0x21   : > { %4362 = sst [smem:[#allocation9_spill]] %s3416_s30  ;;  %p48_p0 = scmp.ge.s32.totalorder %s47_s4, 3 }
  0x22   : > { %4363 = sst [smem:[#allocation10_spill]] %s3420_s7  ;;  %s50_s28 = sadd.s32 1, %s3428_s26 }
  0x23   : > { %4364 = sst [smem:[#allocation11_spill]] %s3424_s3  ;;  %p719_p1 = scmp.ne.s32.totalorder %s3412_s6, %s3408_s2 }
  0x24   : > { %4365 = sst [smem:[#allocation12_spill]] %s3428_s26  ;;  %p720_p2 = scmp.eq.s32.totalorder %s2960_s8, 5 }
  0x25   : > { %4366 = sst [smem:[#allocation13_spill]] %s3432_s1  ;;  %s4446_s4 = smov (%p48_p0, %s47_s4), 0 }
  0x26   : > { %4367 = sst [smem:[#allocation14_spill]] %s4446_s4  ;;  %s4448_s28 = smov (!%p48_p0, %s50_s28), %s3428_s26 }
  0x27   : > { %s704_s9 = ssub.s32 %s3424_s3, %s4446_s4  ;;  %p3623_p3 = por %p720_p2, %p719_p1 }
  0x28   : > { %p52_p4 = scmp.ge.s32.totalorder %s4448_s28, 2  ;;  %p725_p5 = scmp.ne.s32.totalorder %s3408_s2, %s3404_s29 }
  0x29   : > { %s4368_s5 = scalar_select %p3623_p3, 1, 0 }
  0x2a   : > { %p726_p6 = scmp.eq.s32.totalorder %s2961_s27, 5  ;;  %p2964_p7 = scmp.ge.s32.totalorder %s3432_s1, 1 }
  0x2b   : > { %4369 = sst [smem:[#allocation15_spill]] %s4368_s5  ;;  %s4450_s28 = smov (%p52_p4, %s4448_s28), 0 }
  0x2c   : > { %4370 = sst [smem:[#allocation16_spill]] %s4450_s28  ;;  %p3632_p8 = por %p726_p6, %p725_p5 }
  0x2d   : > { %p919_p9 = scmp.lt.s32.totalorder %s3432_s1, 7  ;;  %s705_s8 = ssub.s32 %s3428_s26, %s4450_s28 }
  0x2e   : > { %s4371_s0 = scalar_select %p3632_p8, 1, 0 }
  0x2f   : > { %s709_s25 = sadd.s32 1, %s3412_s6  ;;  %s706_s24 = sor.u32 %s705_s8, %s704_s9 }
  0x30   : > { %4372 = sst [smem:[#allocation17_spill]] %s4371_s0  ;;  %p920_p10 = pnand %p2964_p7, %p919_p9 }
  0x31   : > { %p707_p11 = scmp.eq.s32.totalorder %s706_s24, 0 }
  0x32   : > { %923 = sbr.rel (%p920_p10) target bundleno = 4445 (0x115d), region = 120 }
  0x33   : > { %s3641_s4 = scalar_select %p707_p11, %s3412_s6, %s709_s25  }
  0x35   : > { %4373 = sst [smem:[#allocation18_spill]] %s3641_s4 }
  0x37   : > { %s4319_s27 = sand.u32 1, %s3408_s2   ;;  %p1082_p12 = scmp.lt.s32.totalorder %s3420_s7, 1 }
  0x38   : > { %s3647_s3 = sshll.u32 %s4319_s27, 3  ;;  %p1102_p13 = scmp.lt.s32.totalorder %s3416_s30, 2 }
  0x39   : > { %s3651_s28 = scalar_select %p1082_p12, %s3420_s7, 1 }
  0x3a   : > { %s3654_s24 = scalar_select %p1102_p13, %s3416_s30, 2 }
  0x3b   : > { %4374 = sst [smem:[#allocation19_spill]] %s3651_s28  ;;  %s3657_s25 = sshll.u32 %s3651_s28, 3 }
  0x3c   : > { %s3101_s9 = smul.u32 88, %s3651_s28  ;;  %s4378_s21 = sld [smem:[#allocation26_spill]] }
  0x3d   : > { %s3092_s26 = sshll.u32 %s3654_s24, 5  ;;  %s4380_s6 = sld [smem:[#allocation28_spill]] }
  0x3e   : > { %s4384_s4 = sld [smem:[#allocation32_spill]]  ;;  %s3096_s17 = sshll.u32 %s3654_s24, 4 }
  0x3f   : > { %s4385_s11 = sld [smem:[#allocation33_spill]]  ;;  %s3102_s19 = smul.u32 3, %s3654_s24 }
  0x40   : > { %s4389_s13 = sld [smem:[#allocation35_spill]]  ;;  %s1081_s0 = scalar_lea.vmem [#allocation3], %s3647_s3 }
  0x41   : > { %s4391_s15 = sld [smem:[#allocation37_spill]] }
  0x42   : > { %s3675_s20 = scalar_lea.vmem %s4378_s21, %s3101_s9  ;;  %s4382_s21 = sld [smem:[#allocation30_spill]] }
  0x43   : > { %s3685_s29 = scalar_lea.vmem %s4380_s6, %s3092_s26  ;;  %s4392_s28 = sld [smem:[#allocation38_spill]] }
  0x44   : > { %s3703_s8 = scalar_lea.vmem %s4384_s4, %s3092_s26  ;;  %s4400_s2 = sld [smem:[#allocation45_spill]] }
  0x45   : > { %s3712_s23 = scalar_lea.vmem %s4385_s11, %s3092_s26  ;;  %s3100_s11 = sshll.u32 %s3654_s24, 6 }
  0x46   : > { %4386 = sst [smem:[#allocation20_spill]] %s3712_s23  ;;  %s3726_s6 = scalar_lea.vmem %s4389_s13, %s3096_s17 }
  0x47   : > { %4390 = sst [smem:[#allocation21_spill]] %s3726_s6  ;;  %s3731_s7 = scalar_lea.vmem %s4391_s15, %s3092_s26 }
  0x48   : > { %s3694_s9 = scalar_lea.vmem %s4382_s21, %s3092_s26  ;;  %s4395_s13 = sld [smem:[#allocation40_spill]] }
  0x49   : > { %s3740_s12 = scalar_lea.vmem %s4392_s28, %s3092_s26  ;;  %s4397_s23 = sld [smem:[#allocation42_spill]] }
  0x4a   : > { %4393 = sst [smem:[#allocation22_spill]] %s3740_s12  ;;  %s3774_s15 = scalar_lea.vmem %s4400_s2, %s3102_s19 }
  0x4b   : > { %s4398_s12 = sld [smem:[#allocation43_spill]] }
  0x4c   : > { %s4399_s17 = sld [smem:[#allocation44_spill]] }
  0x4d   : > { %s4401_s6 = sld [smem:[#allocation9_spill]] }
  0x4e   : > { %s3749_s14 = scalar_lea.vmem %s4395_s13, %s3092_s26 }
  0x4f   : > { %s3759_s18 = scalar_lea.vmem %s4397_s23, %s3100_s11 }
  0x51   : > { %s1173_s30 = scalar_lea.vmem %s4398_s12, %s3654_s24 }
  0x52   : > { %s3769_s13 = scalar_lea.vmem %s4399_s17, %s3102_s19 }
  0x53   : > { %p2988_p0 = scmp.ne.s32.totalorder %s4401_s6, 0 }
  0x54   : > { %s4402_s11 = sld [smem:[#allocation23_spill]] (!%p2988_p0) }
  0x55   : > { %1185 = sbr.rel (%p2988_p0) target bundleno = 93 (0x5d), region = 124 }
  0x5a   : > { %s4403_s12 = scalar_lea.vmem %s4402_s11, %s3657_s25  ;;  %vm1187_vm0 = vcmask 261120  }
  0x5b   : > { %v1186_v0 = vld [vmem:[%s4403_s12] sm:$0xff] }
  0x5c   : > { %1188 = vst.msk [vmem:[#allocation2] sm:$0xff] %vm1187_vm0, %v1186_v0 }
  0x5d PF: > { %v1208_v1 = vld [vmem:[%s3685_s29 + $0x18] sm:$0xff]  ;;  %v1207_v2 = vld [vmem:[%s3685_s29 + $0x10] sm:$0xff]  ;;  %v1206_v3 = vld [vmem:[%s3685_s29 + $0x8] sm:$0xff]  ;;  %s4404_s22 = sld [smem:[#allocation24_spill]]  ;;  %vm1213_vm1 = vcmask 261120   ;;  %s3435_s26 = smov 96  }
  0x5e   : > { %1229 = vmatpush.msra.mxu0 %v1208_v1  ;;  %v1205_v6 = vld [vmem:[%s3685_s29] sm:$0xff]  ;;  %s4406_s1 = sld [smem:[#allocation29_spill]]  ;;  %s3434_s29 = smov 120   ;;  %v1240_v11 = vld [vmem:[%s3694_s9 + $0x18] sm:$0xff]  ;;  %v1239_v12 = vld [vmem:[%s3694_s9 + $0x10] sm:$0xff]  ;;  %vm1280_vm2 = vcmask 64512  }
  0x5f   : > { %s3436_s4 = smov 80   ;;  %s3437_s2 = smov 72   ;;  %1260 = vmatpush.msra.mxu1 %v1240_v11  ;;  %v1238_v13 = vld [vmem:[%s3694_s9 + $0x8] sm:$0xff]  ;;  %v1237_v14 = vld [vmem:[%s3694_s9] sm:$0xff]  ;;  %v1271_v11 = vld [vmem:[%s3703_s8 + $0x18] sm:$0xff]  ;;  %vm1709_vm4 = vcmask 1040384  }
  0x60   : > { %1230 = vmatpush.msra.mxu0 %v1207_v2  ;;  %s3438_s23 = smov 112   ;;  %s3439_s5 = smov 104   ;;  %v1268_v34 = vld [vmem:[%s3703_s8] sm:$0xff]  ;;  %vm1705_vm5 = vcmask 72704   ;;  %vm1945_vm9 = vcmask 1043456   ;;  %vm1898_vm10 = vcmask 687104  }
  0x61   : > { %1261 = vmatpush.msra.mxu1 %v1239_v12  ;;  %s4408_s12 = sld [smem:[#allocation31_spill]]  ;;  %s3440_s27 = smov 88   ;;  %vm2551_vm14 = vcmask 523264  }
  0x62   : > { %1231 = vmatpush.msra.mxu0 %v1206_v3  ;;  %v1269_v3 = vld [vmem:[%s3703_s8 + $0x8] sm:$0xff]  ;;  %s4410_s21 = scalar_lea.vmem %s4299_s10, %s3654_s24  ;;  %s4412_s19 = sld [smem:[#allocation20_spill]] }
  0x63   : > { %v3786_v4 = vld [vmem:[#allocation2] sm:$0xff]  ;;  %s4405_s28 = scalar_lea.vmem %s4404_s22, %s3657_s25  ;;  %1262 = vmatpush.msra.mxu1 %v1238_v13  ;;  %v1270_v13 = vld [vmem:[%s3703_s8 + $0x10] sm:$0xff]  ;;  %s4414_s11 = sld [smem:[#allocation25_spill]] }
  0x64   : > { %v3793_v5 = vld [vmem:[%s4405_s28] sm:$0xff]  ;;  %1232 = vmatpush.msra.mxu0 %v1205_v6  ;;  %s4407_s17 = scalar_lea.vmem %s4406_s1, %s3654_s24  ;;  %s4413_s1 = sld [smem:[#allocation21_spill]] }
  0x65   : > { %v1204_v7 = vadd.f32 %v3793_v5, %v3786_v4  ;;  %v3282_v8 = vld [vmem:[%s4407_s17] ss:$0 sm:$0xff]  ;;  %1263 = vmatpush.msra.mxu1 %v1237_v14  ;;  %s4416_s22 = sld [smem:[#allocation34_spill]]  ;;  %s2627_s9 = sshll.u32 %s1081_s0, 4  ;;  %s2628_s9 = int_to_ptr.vmem [resolvable:$true] %s2627_s9 }
  0x66   : > { %2990 = vmatmul.msk.f32.vlgmr.msra.gmra.mxu1 %vm1213_vm1, %v3786_v4  ;;  %v3284_v14 = vld [vmem:[%s4410_s21] ss:$0 sm:$0xff]  ;;  %s4418_s8 = sld [smem:[#allocation36_spill]] }
  0x67   : > { %2989 = vmatmul.msk.f32.vlgmr.msra.gmra.mxu0 %vm1213_vm1, %v1204_v7  ;;  %s4409_s6 = scalar_lea.vmem %s4408_s12, %s3654_s24 }
  0x68   : > { %v3283_v21 = vld [vmem:[%s4409_s6] ss:$0 sm:$0xff] }
  0x69   : > { %s4415_s12 = scalar_lea.vmem %s4414_s11, %s3657_s25  ;;  %s4422_s11 = sld [smem:[#allocation27_spill]] }
  0x6b   : > { %s4417_s28 = scalar_lea.vmem %s4416_s22, %s3654_s24 }
  0xe3   : > { %v1265_v22 = vpop.f32.mrf.mxu1 }
  0xe4   : > { %v1234_v9 = vpop.f32.mrf.mxu0  ;;  %v3825_v23 = vadd.f32 %v3283_v21, %v1265_v22  ;;  %v1740_v21 = vld [vmem:[%s3731_s7 + $0x8] sm:$0xff]  ;;  %v1739_v22 = vld [vmem:[%s3731_s7] sm:$0xff] }
  0xe5   : > { %v1235_v10 = vadd.f32 %v3282_v8, %v1234_v9 }
  0xe6   : > { %1334 = vmatpush.msra.mxu3 %v3825_v23 }
  0xe7   : > { %1363 = vrot.lane.b32.xlu2 %v1235_v10, %s3434_s29  ;;  %1278 = vrot.lane.b32.xlu0 %v1235_v10, %s3435_s26 }
  0xe8   : > { %1357 = vmatpush.msrb.mxu3 %v1268_v34  ;;  %v1197_v34 = vld [vmem:[%s3675_s20 + $0x28] sm:$0xff] }
  0xef   : > { %1455 = vrot.lane.b32.xlu2 %v1235_v10, %s3436_s4 }
  0xf7   : > { %1544 = vrot.lane.b32.xlu2 %v1235_v10, %s3437_s2 }
  0xff   : > { %1453 = vrot.lane.b32.xlu2 %v1235_v10, %s3438_s23 }
 0x107   : > { %1542 = vrot.lane.b32.xlu2 %v1235_v10, %s3439_s5 }
 0x141   : > { %v1364_v15 = vpop.permute.xlu2 %1363 }
 0x149   : > { %v1456_v16 = vpop.permute.xlu2 %1455 }
 0x151   : > { %v1545_v17 = vpop.permute.xlu2 %1544 }
 0x152   : > { %3003 = vmatpush.xpose.msk.msrb.mxu1 %vm1280_vm2, %v1545_v17 }
 0x159   : > { %v1454_v18 = vpop.permute.xlu2 %1453  ;;  %v1279_v19 = vpop.permute.xlu0 %1278 }
 0x15a   : > { %2991 = vmatpush.xpose.msk.msra.mxu2 %vm1280_vm2, %v1279_v19  ;;  %v1742_v19 = vld [vmem:[%s3731_s7 + $0x18] sm:$0xff] }
 0x15d   : > { %2992 = vmatmul.msk.f32.vlgmr.msra.gmra.mxu2 %vm1280_vm2, %v1235_v10 }
 0x161   : > { %v1543_v20 = vpop.permute.xlu2 %1542 }
 0x162   : > { %3004 = vmatmul.msk.f32.vlgmr.msrb.gmra.mxu1 %vm1280_vm2, %v1543_v20  ;;  %v1741_v20 = vld [vmem:[%s3731_s7 + $0x10] sm:$0xff]  ;;  %s4411_s7 = scalar_lea.vmem %s4305_s16, %s3654_s24 }
 0x1df   : > { %v1567_v26 = vpop.f32.mrf.mxu1 }
 0x1e0   : > { %v1302_v24 = vpop.f32.mrf.mxu2  ;;  %v1570_v27 = vsel %vm1280_vm2, %v1567_v26, -inf }
 0x1e1   : > { %v1305_v25 = vsel %vm1280_vm2, %v1302_v24, -inf }
 0x1e2   : > { %1306 = vmax.xlane.f32.xlu0 %v1305_v25  ;;  %v1194_v25 = vld [vmem:[%s3675_s20 + $0x10] sm:$0xff] }
 0x1f6   : > { %1403 = vrot.lane.b32.xlu0 %v3825_v23, %s3434_s29 }
 0x220   : > { %1571 = vmax.xlane.f32.xlu0 %v1570_v27 }
 0x255   : > { %v1307_v28 = vpop.xlane.xlu0 %1306 }
 0x256   : > { %v1308_v29 = vsub.f32 %v1302_v24, %v1307_v28  ;;  %v1193_v24 = vld [vmem:[%s3675_s20 + $0x8] sm:$0xff] }
 0x258   : > { %v1309_v30 = vmul.f32 1.442695, %v1308_v29 }
 0x25a   : > { %3298 = vpow2.f32 %v1309_v30 }
 0x260   : > { %v3299_v31 = vpop.eup %3298 }
 0x261   : > { %v1311_v32 = vsel %vm1280_vm2, %v3299_v31, 0.0 }
 0x262   : > { %1312 = vadd.xlane.f32.xlu1 %v1311_v32 }
 0x268   : > { %v1404_v33 = vpop.permute.xlu0 %1403 }
 0x269   : > { %1424 = vmatpush.msrb.mxu0 %v1404_v33  ;;  %v1196_v33 = vld [vmem:[%s3675_s20 + $0x20] sm:$0xff] }
 0x26b   : > { %1536 = vmatpush.msra.mxu0 %v1270_v13 }
 0x27b   : > { %1365 = vrot.lane.b32.xlu1 %v1235_v10, %s3440_s27 }
 0x293   : > { %v1572_v43 = vpop.xlane.xlu0 %1571 }
 0x294   : > { %v1573_v46 = vsub.f32 %v1567_v26, %v1572_v43 }
 0x296   : > { %v1574_v50 = vmul.f32 1.442695, %v1573_v46 }
 0x2d5   : > { %v1313_v35 = vpop.xlane.xlu1 %1312 }
 0x2d6   : > { %3300 = vrcp.f32 %v1313_v35  ;;  %v1198_v35 = vld [vmem:[%s3675_s20 + $0x30] sm:$0xff] }
 0x2dc   : > { %v3301_v36 = vpop.eup %3300 }
 0x2dd   : > { %v1315_v37 = vmul.f32 %v3301_v36, %v3299_v31  ;;  %v1195_v31 = vld [vmem:[%s3675_s20 + $0x18] sm:$0xff] }
 0x2de   : > { %v1199_v36 = vld [vmem:[%s3675_s20 + $0x38] sm:$0xff] }
 0x2df   : > { %2993 = vmatmul.msk.f32.vlgmr.msra.gmra.mxu3 %vm1280_vm2, %v1315_v37  ;;  %v1201_v37 = vld [vmem:[%s3675_s20 + $0x48] sm:$0xff] }
 0x2e0   : > { %2999 = vmatpush.xpose.msk.msra.mxu3 %vm1280_vm2, %v1456_v16 }
 0x2ed   : > { %v1366_v38 = vpop.permute.xlu1 %1365 }
 0x2ee   : > { %2995 = vmatpush.xpose.msk.msrb.mxu2 %vm1280_vm2, %v1366_v38  ;;  %v1202_v38 = vld [vmem:[%s3675_s20 + $0x50] sm:$0xf] }
 0x2f1   : > { %2996 = vmatmul.msk.f32.vlgmr.msrb.gmra.mxu2 %vm1280_vm2, %v1364_v15 }
 0x2f2   : > { %1447 = vmatpush.msra.mxu2 %v1269_v3 }
 0x362   : > { %v1336_v39 = vpop.f32.mrf.mxu3 }
 0x363   : > { %2994 = vmatmul.msk.f32.vlgmr.msrb.gmra.mxu3 %vm1280_vm2, %v1336_v39  ;;  %v3441_v39 = vmov 32.0  }
 0x36b   : > { %3000 = vmatmul.msk.f32.vlgmr.msra.gmra.mxu3 %vm1280_vm2, %v1454_v18 }
 0x374   : > { %v1388_v40 = vpop.f32.mrf.mxu2 }
 0x375   : > { %v1391_v41 = vsel %vm1280_vm2, %v1388_v40, -inf }
 0x376   : > { %1392 = vmax.xlane.f32.xlu1 %v1391_v41 }
 0x3e6   : > { %v1359_v42 = vpop.f32.mrf.mxu3 }
 0x3e7   : > { %v1362_v15 = vadd.f32 %v3284_v14, %v1359_v42  ;;  %v1674_v14 = vld [vmem:[%s4412_s19 + $0x10] sm:$0xff] }
 0x3e9   : > { %v1393_v44 = vpop.xlane.xlu1 %1392 }
 0x3ea   : > { %v1394_v45 = vsub.f32 %v1388_v40, %v1393_v44 }
 0x3ec   : > { %v1395_v47 = vmul.f32 1.442695, %v1394_v45 }
 0x3ee   : > { %3302 = vpow2.f32 %v1395_v47  ;;  %v1478_v48 = vpop.f32.mrf.mxu3 }
 0x3ef   : > { %v1481_v49 = vsel %vm1280_vm2, %v1478_v48, -inf  ;;  %3304 = vpow2.f32 %v1574_v50 }
 0x3f0   : > { %1482 = vmax.xlane.f32.xlu1 %v1481_v49 }
 0x3f4   : > { %v3303_v51 = vpop.eup %3302 }
 0x3f5   : > { %v1397_v52 = vsel %vm1280_vm2, %v3303_v51, 0.0  ;;  %v3305_v53 = vpop.eup %3304 }
 0x3f6   : > { %1398 = vadd.xlane.f32.xlu2 %v1397_v52  ;;  %v1576_v54 = vsel %vm1280_vm2, %v3305_v53, 0.0 }
 0x3fe   : > { %1577 = vadd.xlane.f32.xlu2 %v1576_v54 }
 0x416   : > { %1581 = vrot.lane.b32.xlu2 %v3825_v23, %s3439_s5 }
 0x463   : > { %v1483_v55 = vpop.xlane.xlu1 %1482 }
 0x464   : > { %v1484_v56 = vsub.f32 %v1478_v48, %v1483_v55 }
 0x466   : > { %v1485_v57 = vmul.f32 1.442695, %v1484_v56 }
 0x468   : > { %3306 = vpow2.f32 %v1485_v57 }
 0x469   : > { %v1399_v58 = vpop.xlane.xlu2 %1398 }
 0x46a   : > { %3308 = vrcp.f32 %v1399_v58 }
 0x46e   : > { %v3307_v59 = vpop.eup %3306 }
 0x46f   : > { %v1487_v60 = vsel %vm1280_vm2, %v3307_v59, 0.0 }
 0x470   : > { %v3309_v61 = vpop.eup %3308  ;;  %1488 = vadd.xlane.f32.xlu1 %v1487_v60 }
 0x471   : > { %v1578_v62 = vpop.xlane.xlu2 %1577  ;;  %v1401_v63 = vmul.f32 %v3309_v61, %v3303_v51  ;;  %v3285_v61 = vld [vmem:[%s4411_s7] ss:$0 sm:$0xff]  ;;  %s4419_s7 = scalar_lea.vmem %s4418_s8, %s3654_s24 }
 0x472   : > { %3310 = vrcp.f32 %v1578_v62 }
 0x473   : > { %2997 = vmatmul.msk.f32.vlgmr.msrb.gmra.mxu0 %vm1280_vm2, %v1401_v63 }
 0x478   : > { %v3311_v0 = vpop.eup %3310 }
 0x479   : > { %v1580_v1 = vmul.f32 %v3311_v0, %v3305_v53  ;;  %v1582_v2 = vpop.permute.xlu2 %1581 }
 0x47a   : > { %1602 = vmatpush.msrb.mxu3 %v1582_v2 }
 0x47b   : > { %3005 = vmatmul.msk.f32.vlgmr.msrb.gmra.mxu3 %vm1280_vm2, %v1580_v1 }
 0x47c   : > { %1792 = vmatpush.msra.mxu3 %v1742_v19  ;;  %v1703_v19 = vld [vmem:[%s4413_s1] sm:$0xff] }
 0x47e   : > { %1793 = vmatpush.msra.mxu3 %v1741_v20  ;;  %v1191_v20 = vld [vmem:[%s4415_s12] sm:$0xff] }
 0x480   : > { %1794 = vmatpush.msra.mxu3 %v1740_v21 }
 0x482   : > { %1795 = vmatpush.msra.mxu3 %v1739_v22 }
 0x489   : > { %1492 = vrot.lane.b32.xlu1 %v3825_v23, %s3438_s23  ;;  %v1192_v23 = vld [vmem:[%s3675_s20] sm:$0xff] }
 0x48a   : > { %3010 = vmatmul.msk.f32.vlgmr.msra.gmra.mxu3 %vm1213_vm1, %v1192_v23 }
 0x492   : > { %3011 = vmatmul.msk.f32.gmra.mxu3 %vm1213_vm1, %v1193_v24 }
 0x49a   : > { %3012 = vmatmul.msk.f32.gmra.mxu3 %vm1213_vm1, %v1194_v25 }
 0x4a2   : > { %3013 = vmatmul.msk.f32.gmra.mxu3 %vm1213_vm1, %v1195_v31 }
 0x4aa   : > { %3014 = vmatmul.msk.f32.gmra.mxu3 %vm1213_vm1, %v1196_v33 }
 0x4b2   : > { %3015 = vmatmul.msk.f32.gmra.mxu3 %vm1213_vm1, %v1197_v34  ;;  %v3287_v34 = vld [vmem:[%s3774_s15] ss:$0 sm:$0xff] }
 0x4ba   : > { %3016 = vmatmul.msk.f32.gmra.mxu3 %vm1213_vm1, %v1198_v35 }
 0x4c2   : > { %3017 = vmatmul.msk.f32.gmra.mxu3 %vm1213_vm1, %v1199_v36 }
 0x4e3   : > { %v1489_v6 = vpop.xlane.xlu1 %1488 }
 0x4e4   : > { %3312 = vrcp.f32 %v1489_v6 }
 0x4e5   : > { %3314 = vrcp.f32 %v3441_v39 }
 0x4ea   : > { %v3313_v8 = vpop.eup %3312 }
 0x4eb   : > { %v1491_v9 = vmul.f32 %v3313_v8, %v3307_v59  ;;  %v3315_v40 = vpop.eup %3314 }
 0x4ec   : > { %v1638_v41 = vmul.f32 32.0, %v3315_v40  ;;  %vm1642_vm3 = vweird.f32 %v3315_v40 }
 0x4ee   : > { %v1639_v42 = vsub.f32 1.0, %v1638_v41 }
 0x4f0   : > { %v1426_v7 = vpop.f32.mrf.mxu0  ;;  %v1640_v43 = vmul.f32 %v3315_v40, %v1639_v42 }
 0x4f1   : > { %2998 = vmatmul.msk.f32.vlgmr.msra.gmra.mxu2 %vm1280_vm2, %v1426_v7 }
 0x4f2   : > { %v1641_v45 = vadd.f32 %v3315_v40, %v1640_v43 }
 0x4f4   : > { %v3892_v46 = vsel %vm1642_vm3, %v3315_v40, %v1641_v45 }
 0x4fb   : > { %v1493_v10 = vpop.permute.xlu1 %1492 }
 0x4fc   : > { %1513 = vmatpush.msrb.mxu2 %v1493_v10 }
 0x4fd   : > { %3001 = vmatmul.msk.f32.vlgmr.msrb.gmra.mxu2 %vm1280_vm2, %v1491_v9 }
 0x4fe   : > { %1625 = vmatpush.msra.mxu2 %v1271_v11  ;;  %v1604_v12 = vpop.f32.mrf.mxu3 }
 0x505   : > { %3006 = vmatmul.msk.f32.vlgmr.msra.gmra.mxu2 %vm1280_vm2, %v1604_v12  ;;  %v1675_v12 = vld [vmem:[%s4412_s19 + $0x18] sm:$0xff] }
 0x506   : > { %1695 = vmatpush.msrb.mxu0 %v1675_v12 }
 0x508   : > { %1696 = vmatpush.msrb.mxu0 %v1674_v14 }
 0x50d   : > { %v1797_v44 = vpop.f32.mrf.mxu3 }
 0x50e   : > { %v3937_v9 = vadd.f32 %v3285_v61, %v1797_v44 }
 0x515   : > { %v1800_v48 = vpop.f32.mrf.mxu3 }
 0x516   : > { %v3939_v10 = vadd.f32 %v3285_v61, %v1800_v48  ;;  %v3288_v48 = vld [vmem:[%s4417_s28] ss:$0 sm:$0xff]  ;;  %s4429_s28 = sld [smem:[#allocation9_spill]] }
 0x518   : > { %v3945_v11 = vpack.i.bf16 %v3937_v9, %v3939_v10 }
 0x51d   : > { %v1803_v53 = vpop.f32.mrf.mxu3 }
 0x525   : > { %v1806_v54 = vpop.f32.mrf.mxu3 }
 0x526   : > { %v3948_v13 = vadd.f32 %v3285_v61, %v1806_v54 }
 0x52d   : > { %v1809_v55 = vpop.f32.mrf.mxu3 }
 0x52e   : > { %v3921_v3 = vadd.f32 %v3285_v61, %v1809_v55 }
 0x535   : > { %v1812_v56 = vpop.f32.mrf.mxu3 }
 0x536   : > { %v3923_v6 = vadd.f32 %v3285_v61, %v1812_v56 }
 0x538   : > { %v3931_v8 = vpack.i.bf16 %v3921_v3, %v3923_v6 }
 0x53d   : > { %v1815_v57 = vpop.f32.mrf.mxu3 }
 0x53e   : > { %v3925_v7 = vadd.f32 %v3285_v61, %v1815_v57 }
 0x545   : > { %v1818_v58 = vpop.f32.mrf.mxu3 }
 0x546   : > { %v3917_v2 = vadd.f32 %v3285_v61, %v1818_v58 }
 0x548   : > { %v3983_v25 = vpack.i.bf16 %v3925_v7, %v3917_v2 }
 0x574   : > { %v1449_v16 = vpop.f32.mrf.mxu2 }
 0x575   : > { %v1452_v17 = vadd.f32 %v1449_v16, %v1362_v15  ;;  %v1673_v15 = vld [vmem:[%s4412_s19 + $0x8] sm:$0xff] }
 0x576   : > { %v1704_v16 = vld [vmem:[%s4413_s1 + $0x8] sm:$0x1]  ;;  %1697 = vmatpush.msrb.mxu0 %v1673_v15  ;;  %s4421_s1 = sld [smem:[#allocation22_spill]] }
 0x577   : > { %3008 = vmatpush.msk.msra.mxu1 %vm1709_vm4, %v1704_v16 }
 0x579   : > { %1728 = vmatpush.msra.mxu1 %v1703_v19 }
 0x57a   : > { %3009 = vmatmul.msk.f32.vlgmr.msra.gmra.mxu1 %vm1705_vm5, %v1191_v20 }
 0x580   : > { %v1515_v18 = vpop.f32.mrf.mxu2 }
 0x581   : > { %3002 = vmatmul.msk.f32.vlgmr.msra.gmra.mxu0 %vm1280_vm2, %v1515_v18  ;;  %v3958_v18 = vadd.f32 %v3285_v61, %v1803_v53 }
 0x583   : > { %v4032_v55 = vpack.i.bf16 %v3958_v18, %v3948_v13 }
 0x588   : > { %v1627_v28 = vpop.f32.mrf.mxu2 }
 0x5fe   : > { %v1538_v26 = vpop.f32.mrf.mxu0 }
 0x5ff   : > { %v1541_v27 = vadd.f32 %v1538_v26, %v1452_v17  ;;  %v1672_v17 = vld [vmem:[%s4412_s19] sm:$0xff]  ;;  %s4420_s19 = sld [smem:[#allocation19_spill]] }
 0x600   : > { %1698 = vmatpush.msrb.mxu0 %v1672_v17 }
 0x601   : > { %v1630_v29 = vadd.f32 %v1627_v28, %v1541_v27 }
 0x603   : > { %v1631_v30 = vadd.f32 %v1630_v29, %v3786_v4  ;;  %v1200_v4 = vld [vmem:[%s3675_s20 + $0x40] sm:$0xff]  ;;  %s4431_s20 = sld [smem:[#allocation7_spill]] }
 0x604   : > { %3018 = vmatmul.msk.f32.gmra.mxu3 %vm1213_vm1, %v1200_v4 }
 0x605   : > { %v1634_v32 = vsel %vm1213_vm1, %v1631_v30, 0.0  ;;  %s4423_s12 = scalar_lea.vmem %s4422_s11, %s4420_s19  ;;  %s4432_s19 = sld [smem:[#allocation46_spill]] }
 0x606   : > { %1635 = vadd.xlane.f32.xlu0 %v1634_v32  ;;  %v3286_v32 = vld [vmem:[%s3769_s13] ss:$0 sm:$0xff] }
 0x607   : > { %v4057_v56 = vld [vmem:[%s4423_s12] ss:$0 sm:$0xff] }
 0x60c   : > { %3019 = vmatmul.msk.f32.gmra.mxu3 %vm1213_vm1, %v1201_v37 }
 0x614   : > { %3020 = vmatmul.msk.f32.gmra.mxu3 %vm1213_vm1, %v1202_v38 }
 0x679   : > { %v1636_v47 = vpop.xlane.xlu0 %1635 }
 0x67a   : > { %v1644_v49 = vmul.f32 %v3892_v46, %v1636_v47 }
 0x67c   : > { %v3895_v50 = vsub.f32 %v1631_v30, %v1644_v49 }
 0x67e   : > { %v1646_v51 = vmul.f32 %v3895_v50, %v3895_v50 }
 0x680   : > { %v1647_v52 = vsel %vm1213_vm1, %v1646_v51, 0.0 }
 0x681   : > { %1648 = vadd.xlane.f32.xlu2 %v1647_v52  ;;  %v3289_v52 = vld [vmem:[%s4419_s7] ss:$0 sm:$0xff] }
 0x687   : > { %v1821_v59 = vpop.f32.mrf.mxu3 }
 0x688   : > { %v3913_v1 = vadd.f32 %v3285_v61, %v1821_v59 }
 0x68f   : > { %v1824_v60 = vpop.f32.mrf.mxu3 }
 0x690   : > { %v3907_v0 = vadd.f32 %v3285_v61, %v1824_v60  ;;  %v1830_v60 = vld [vmem:[%s4421_s1] sm:$0xff] }
 0x691   : > { %1986 = vmatpush.msrb.mxu1 %v1830_v60 }
 0x692   : > { %v3970_v21 = vpack.i.bf16 %v3913_v1, %v3907_v0 }
 0x697   : > { %v1827_v62 = vpop.f32.mrf.mxu3 }
 0x698   : > { %v3905_v63 = vadd.f32 %v3285_v61, %v1827_v62 }
 0x699   : > { %3193 = vrot.lane.b32.xlu2 %v3931_v8, %s3435_s26 }
 0x69a   : > { %3021 = vmatpush.xpose.msk.msrb.mxu2 %vm1280_vm2, %v3905_v63  ;;  %1930 = vrot.lane.b32.xlu0 %v3905_v63, %s3435_s26 }
 0x69e   : > { %3022 = vmatpush.xpose.msk.msrb.mxu2 %vm1280_vm2, %v3907_v0 }
 0x6a1   : > { %3203 = vrot.lane.b32.xlu2 %v3945_v11, %s3435_s26 }
 0x6a2   : > { %3023 = vmatpush.xpose.msk.msrb.mxu2 %vm1280_vm2, %v3913_v1  ;;  %3183 = vrot.lane.b32.xlu0 %v3970_v21, %s3435_s26 }
 0x6a6   : > { %3024 = vmatpush.xpose.msk.msrb.mxu2 %vm1280_vm2, %v3917_v2 }
 0x6a9   : > { %2012 = vrot.lane.b32.xlu2 %v3907_v0, %s3434_s29 }
 0x6aa   : > { %3025 = vmatpush.xpose.msk.msrb.mxu2 %vm1280_vm2, %v3925_v7  ;;  %3188 = vrot.lane.b32.xlu0 %v3983_v25, %s3435_s26 }
 0x6ae   : > { %3026 = vmatpush.xpose.msk.msrb.mxu2 %vm1280_vm2, %v3923_v6 }
 0x6b1   : > { %2008 = vrot.lane.b32.xlu2 %v3917_v2, %s3434_s29 }
 0x6b2   : > { %3027 = vmatpush.xpose.msk.msrb.mxu2 %vm1280_vm2, %v3921_v3 }
 0x6b6   : > { %3028 = vmatpush.xpose.msk.msrb.mxu2 %vm1280_vm2, %v3948_v13 }
 0x6b9   : > { %2002 = vrot.lane.b32.xlu2 %v3921_v3, %s3434_s29 }
 0x6ba   : > { %3029 = vmatpush.xpose.msk.msrb.mxu2 %vm1280_vm2, %v3958_v18 }
 0x6be   : > { %3030 = vmatpush.xpose.msk.msrb.mxu2 %vm1280_vm2, %v3939_v10 }
 0x6c1   : > { %1998 = vrot.lane.b32.xlu2 %v3958_v18, %s3434_s29 }
 0x6c2   : > { %3031 = vmatpush.xpose.msk.msrb.mxu2 %vm1280_vm2, %v3937_v9 }
 0x6f4   : > { %v1649_v22 = vpop.xlane.xlu2 %1648 }
 0x6f5   : > { %v1650_v23 = vmul.f32 %v1649_v22, %v3892_v46 }
 0x6f7   : > { %v1651_v24 = vadd.f32 1e-05, %v1650_v23 }
 0x6f9   : > { %3316 = vrsqrt.f32 %v1651_v24  ;;  %vm1658_vm7 = vweird.f32 %v1651_v24 }
 0x6fc   : > { %v3194_v44 = vpop.permute.xlu2 %3193 }
 0x6fd   : > { %v3195_v45 = vunpack.i.l.bf16 %v3194_v44 }
 0x6ff   : > { %v3317_v26 = vpop.eup %3316 }
 0x700   : > { %v1653_v27 = vmul.f32 %v3317_v26, %v1651_v24  ;;  %vm1659_vm6 = vweird.f32 %v3317_v26 }
 0x701   : > { %vm1660_vm8 = vmor %vm1658_vm7, %vm1659_vm6 }
 0x702   : > { %v1654_v28 = vmul.f32 %v3317_v26, %v1653_v27 }
 0x704   : > { %v1655_v29 = vmul.f32 0.5, %v1654_v28  ;;  %v3204_v16 = vpop.permute.xlu2 %3203 }
 0x705   : > { %v3205_v20 = vunpack.i.l.bf16 %v3204_v16  ;;  %v3206_v22 = vunpack.i.h.bf16 %v3204_v16 }
 0x706   : > { %v1656_v30 = vsub.f32 1.5, %v1655_v29 }
 0x708   : > { %v1657_v31 = vmul.f32 %v3317_v26, %v1656_v30 }
 0x70a   : > { %v1661_v33 = vsel %vm1660_vm8, %v3317_v26, %v1657_v31 }
 0x70b   : > { %v1662_v35 = vmul.f32 %v1661_v33, %v3895_v50  ;;  %v1730_v50 = vpop.f32.mrf.mxu1 }
 0x70c   : > { %v1931_v38 = vpop.permute.xlu0 %1930  ;;  %v2013_v23 = vpop.permute.xlu2 %2012 }
 0x70d   : > { %v1666_v36 = vmul.f32 %v3286_v32, %v1662_v35  ;;  %3033 = vmatpush.msk.msra.mxu0 %vm1945_vm9, %v1931_v38 }
 0x70f   : > { %v3998_v4 = vadd.f32 %v3287_v34, %v1666_v36 }
 0x711   : > { %v1671_v37 = vadd.f32 %v3998_v4, %v3793_v5  ;;  %v3196_v5 = vunpack.i.h.bf16 %v3194_v44 }
 0x713   : > { %3007 = vmatmul.msk.f32.vlgmr.msrb.gmra.mxu0 %vm1213_vm1, %v1671_v37 }
 0x714   : > { %v3184_v39 = vpop.permute.xlu0 %3183  ;;  %v2009_v26 = vpop.permute.xlu2 %2008 }
 0x715   : > { %v3185_v40 = vunpack.i.l.bf16 %v3184_v39  ;;  %v3186_v41 = vunpack.i.h.bf16 %v3184_v39 }
 0x717   : > { %1954 = vmatpush.msra.mxu0 %v3185_v40 }
 0x719   : > { %1955 = vmatpush.msra.mxu0 %v3186_v41 }
 0x71c   : > { %v3189_v42 = vpop.permute.xlu0 %3188  ;;  %v2003_v27 = vpop.permute.xlu2 %2002 }
 0x71d   : > { %v3190_v43 = vunpack.i.l.bf16 %v3189_v42  ;;  %v3191_v47 = vunpack.i.h.bf16 %v3189_v42 }
 0x71f   : > { %1956 = vmatpush.msra.mxu0 %v3190_v43 }
 0x721   : > { %1957 = vmatpush.msra.mxu0 %v3191_v47 }
 0x723   : > { %1958 = vmatpush.msra.mxu0 %v3195_v45 }
 0x724   : > { %v1999_v28 = vpop.permute.xlu2 %1998 }
 0x725   : > { %1959 = vmatpush.msra.mxu0 %v3196_v5 }
 0x790   : > { %v1700_v49 = vpop.f32.mrf.mxu0 }
 0x791   : > { %v1701_v51 = vadd.f32 %v3288_v48, %v1700_v49 }
 0x793   : > { %v1733_v53 = vadd.f32 %v1730_v50, %v1701_v51 }
 0x795   : > { %v4014_v54 = vadd.f32 %v3289_v52, %v1733_v53 }
 0x797   : > { %1992 = vrot.lane.b32.xlu2 %v4014_v54, %s3434_s29  ;;  %3032 = vmatmul.msk.f32.vlgmr.msrb.gmra.mxu2 %vm1280_vm2, %v4014_v54 }
 0x79f   : > { %2172 = vrot.lane.b32.xlu2 %v3907_v0, %s3438_s23 }
 0x7a7   : > { %2168 = vrot.lane.b32.xlu2 %v3917_v2, %s3438_s23 }
 0x7af   : > { %3208 = vrot.lane.b32.xlu2 %v3970_v21, %s3440_s27 }
 0x7b7   : > { %3213 = vrot.lane.b32.xlu2 %v3983_v25, %s3440_s27 }
 0x7bf   : > { %3218 = vrot.lane.b32.xlu2 %v3931_v8, %s3440_s27 }
 0x7c7   : > { %3223 = vrot.lane.b32.xlu2 %v4032_v55, %s3440_s27 }
 0x7cf   : > { %2160 = vrot.lane.b32.xlu2 %v3948_v13, %s3438_s23 }
 0x7d7   : > { %3228 = vrot.lane.b32.xlu2 %v3945_v11, %s3440_s27 }
 0x7df   : > { %2156 = vrot.lane.b32.xlu2 %v3939_v10, %s3438_s23 }
 0x7e7   : > { %2152 = vrot.lane.b32.xlu2 %v4014_v54, %s3438_s23 }
 0x7ef   : > { %2332 = vrot.lane.b32.xlu2 %v3907_v0, %s3439_s5 }
 0x7f1   : > { %v1993_v29 = vpop.permute.xlu2 %1992 }
 0x7f7   : > { %2326 = vrot.lane.b32.xlu2 %v3925_v7, %s3439_s5 }
 0x7f9   : > { %v2173_v30 = vpop.permute.xlu2 %2172 }
 0x7ff   : > { %2322 = vrot.lane.b32.xlu2 %v3921_v3, %s3439_s5 }
 0x801   : > { %v2169_v32 = vpop.permute.xlu2 %2168 }
 0x807   : > { %2316 = vrot.lane.b32.xlu2 %v3939_v10, %s3439_s5 }
 0x809   : > { %v3209_v35 = vpop.permute.xlu2 %3208 }
 0x80a   : > { %v3210_v47 = vunpack.i.l.bf16 %v3209_v35  ;;  %v3211_v5 = vunpack.i.h.bf16 %v3209_v35 }
 0x81a   : > { %v1895_v57 = vpop.f32.mrf.mxu2 }
 0x81b   : > { %v1896_v58 = vadd.f32 %v4057_v56, %v1895_v57 }
 0x81d   : > { %v1899_v59 = vsel %vm1898_vm10, %v1896_v58, -inf }
 0x81e   : > { %1900 = vmax.xlane.f32.xlu1 %v1899_v59 }
 0x837   : > { %3198 = vrot.lane.b32.xlu1 %v4032_v55, %s3435_s26 }
 0x83f   : > { %2014 = vrot.lane.b32.xlu1 %v3905_v63, %s3434_s29 }
 0x847   : > { %2010 = vrot.lane.b32.xlu1 %v3913_v1, %s3434_s29 }
 0x84f   : > { %2004 = vrot.lane.b32.xlu1 %v3923_v6, %s3434_s29 }
 0x857   : > { %2000 = vrot.lane.b32.xlu1 %v3948_v13, %s3434_s29 }
 0x85f   : > { %1996 = vrot.lane.b32.xlu1 %v3939_v10, %s3434_s29 }
 0x891   : > { %v1901_v61 = vpop.xlane.xlu1 %1900 }
 0x892   : > { %v1902_v62 = vsub.f32 %v1896_v58, %v1901_v61 }
 0x894   : > { %v1903_v0 = vmul.f32 1.442695, %v1902_v62 }
 0x896   : > { %3318 = vpow2.f32 %v1903_v0 }
 0x89c   : > { %v3319_v12 = vpop.eup %3318 }
 0x89d   : > { %v1905_v14 = vsel %vm1898_vm10, %v3319_v12, 0.0 }
 0x89e   : > { %1906 = vadd.xlane.f32.xlu0 %v1905_v14 }
 0x8a9   : > { %v3199_v15 = vpop.permute.xlu1 %3198 }
 0x8aa   : > { %v3200_v17 = vunpack.i.l.bf16 %v3199_v15  ;;  %v3201_v19 = vunpack.i.h.bf16 %v3199_v15 }
 0x8ac   : > { %1960 = vmatpush.msra.mxu0 %v3200_v17 }
 0x8ae   : > { %1961 = vmatpush.msra.mxu0 %v3201_v19 }
 0x8b0   : > { %1962 = vmatpush.msra.mxu0 %v3205_v20 }
 0x8b1   : > { %v2015_v10 = vpop.permute.xlu1 %2014 }
 0x8b2   : > { %2006 = vrot.lane.b32.xlu0 %v3925_v7, %s3434_s29  ;;  %1963 = vmatpush.msra.mxu0 %v3206_v22 }
 0x8b3   : > { %3036 = vmatpush.xpose.msk.msra.mxu1 %vm1280_vm2, %v2015_v10 }
 0x8b7   : > { %3037 = vmatpush.xpose.msk.msra.mxu1 %vm1280_vm2, %v2013_v23 }
 0x8b9   : > { %v2011_v24 = vpop.permute.xlu1 %2010 }
 0x8ba   : > { %1994 = vrot.lane.b32.xlu0 %v3937_v9, %s3434_s29 }
 0x8bb   : > { %3038 = vmatpush.xpose.msk.msra.mxu1 %vm1280_vm2, %v2011_v24 }
 0x8bf   : > { %3039 = vmatpush.xpose.msk.msra.mxu1 %vm1280_vm2, %v2009_v26 }
 0x8c1   : > { %v2005_v36 = vpop.permute.xlu1 %2004 }
 0x8c2   : > { %2174 = vrot.lane.b32.xlu0 %v3905_v63, %s3438_s23 }
 0x8c9   : > { %v2001_v39 = vpop.permute.xlu1 %2000 }
 0x8ca   : > { %2170 = vrot.lane.b32.xlu0 %v3913_v1, %s3438_s23 }
 0x8d1   : > { %v1997_v42 = vpop.permute.xlu1 %1996 }
 0x8d2   : > { %2091 = vrot.lane.b32.xlu0 %v3905_v63, %s3440_s27 }
 0x8da   : > { %2166 = vrot.lane.b32.xlu0 %v3925_v7, %s3438_s23  ;;  %v3214_v7 = vpop.permute.xlu2 %3213 }
 0x8db   : > { %v3215_v49 = vunpack.i.l.bf16 %v3214_v7  ;;  %v3216_v50 = vunpack.i.h.bf16 %v3214_v7 }
 0x8e2   : > { %2164 = vrot.lane.b32.xlu0 %v3923_v6, %s3438_s23  ;;  %v3219_v40 = vpop.permute.xlu2 %3218 }
 0x8e3   : > { %v3220_v51 = vunpack.i.l.bf16 %v3219_v40  ;;  %v3221_v52 = vunpack.i.h.bf16 %v3219_v40 }
 0x8ea   : > { %v3224_v44 = vpop.permute.xlu2 %3223 }
 0x8eb   : > { %v3225_v53 = vunpack.i.l.bf16 %v3224_v44  ;;  %v3226_v58 = vunpack.i.h.bf16 %v3224_v44 }
 0x8f2   : > { %v2161_v48 = vpop.permute.xlu2 %2160 }
 0x8fa   : > { %v3229_v57 = vpop.permute.xlu2 %3228 }
 0x8fb   : > { %v3230_v59 = vunpack.i.l.bf16 %v3229_v57  ;;  %v3231_v60 = vunpack.i.h.bf16 %v3229_v57 }
 0x902   : > { %v2157_v19 = vpop.permute.xlu2 %2156 }
 0x90a   : > { %v2153_v10 = vpop.permute.xlu2 %2152 }
 0x911   : > { %v1907_v31 = vpop.xlane.xlu0 %1906 }
 0x912   : > { %3320 = vrcp.f32 %v1907_v31  ;;  %v2333_v24 = vpop.permute.xlu2 %2332 }
 0x918   : > { %v3321_v33 = vpop.eup %3320 }
 0x919   : > { %v1909_v34 = vmul.f32 %v3321_v33, %v3319_v12 }
 0x91b   : > { %3034 = vmatmul.msk.f32.vlgmr.msra.gmra.mxu0 %vm1898_vm10, %v1909_v34 }
 0x924   : > { %v2007_v37 = vpop.permute.xlu0 %2006 }
 0x925   : > { %3040 = vmatpush.xpose.msk.msra.mxu1 %vm1280_vm2, %v2007_v37 }
 0x929   : > { %3041 = vmatpush.xpose.msk.msra.mxu1 %vm1280_vm2, %v2005_v36 }
 0x92c   : > { %v1995_v38 = vpop.permute.xlu0 %1994 }
 0x92d   : > { %3042 = vmatpush.xpose.msk.msra.mxu1 %vm1280_vm2, %v2003_v27 }
 0x931   : > { %3043 = vmatpush.xpose.msk.msra.mxu1 %vm1280_vm2, %v2001_v39 }
 0x934   : > { %v2175_v41 = vpop.permute.xlu0 %2174 }
 0x935   : > { %3044 = vmatpush.xpose.msk.msra.mxu1 %vm1280_vm2, %v1999_v28 }
 0x939   : > { %3045 = vmatpush.xpose.msk.msra.mxu1 %vm1280_vm2, %v1997_v42 }
 0x93c   : > { %v2171_v43 = vpop.permute.xlu0 %2170 }
 0x93d   : > { %3046 = vmatpush.xpose.msk.msra.mxu1 %vm1280_vm2, %v1995_v38 }
 0x944   : > { %v2092_v45 = vpop.permute.xlu0 %2091 }
 0x945   : > { %3048 = vmatpush.msk.msrb.mxu0 %vm1945_vm9, %v2092_v45 }
 0x947   : > { %2114 = vmatpush.msrb.mxu0 %v3210_v47 }
 0x949   : > { %2115 = vmatpush.msrb.mxu0 %v3211_v5 }
 0x94b   : > { %2116 = vmatpush.msrb.mxu0 %v3215_v49 }
 0x94c   : > { %v2167_v61 = vpop.permute.xlu0 %2166 }
 0x94d   : > { %2117 = vmatpush.msrb.mxu0 %v3216_v50 }
 0x94f   : > { %2118 = vmatpush.msrb.mxu0 %v3220_v51 }
 0x951   : > { %2119 = vmatpush.msrb.mxu0 %v3221_v52 }
 0x953   : > { %2120 = vmatpush.msrb.mxu0 %v3225_v53 }
 0x954   : > { %v2165_v62 = vpop.permute.xlu0 %2164 }
 0x955   : > { %2121 = vmatpush.msrb.mxu0 %v3226_v58 }
 0x957   : > { %2122 = vmatpush.msrb.mxu0 %v3230_v59 }
 0x959   : > { %2123 = vmatpush.msrb.mxu0 %v3231_v60 }
 0x95b   : > { %3051 = vmatpush.xpose.msk.msra.mxu0 %vm1280_vm2, %v2175_v41 }
 0x95f   : > { %3052 = vmatpush.xpose.msk.msra.mxu0 %vm1280_vm2, %v2173_v30 }
 0x963   : > { %3053 = vmatpush.xpose.msk.msra.mxu0 %vm1280_vm2, %v2171_v43 }
 0x967   : > { %3054 = vmatpush.xpose.msk.msra.mxu0 %vm1280_vm2, %v2169_v32  ;;  %v2327_v32 = vpop.permute.xlu2 %2326 }
 0x96b   : > { %3055 = vmatpush.xpose.msk.msra.mxu0 %vm1280_vm2, %v2167_v61 }
 0x96f   : > { %3056 = vmatpush.xpose.msk.msra.mxu0 %vm1280_vm2, %v2165_v62  ;;  %v2323_v35 = vpop.permute.xlu2 %2322  ;;  %v1832_v62 = vld [vmem:[%s4421_s1 + $0x10] sm:$0xff] }
 0x977   : > { %v2317_v40 = vpop.permute.xlu2 %2316 }
 0x998   : > { %v1965_v0 = vpop.f32.mrf.mxu0 }
 0x999   : > { %3035 = vmatmul.msk.f32.vlgmr.msrb.gmra.mxu1 %vm1280_vm2, %v1965_v0 }
 0x99a   : > { %2306 = vmatpush.msrb.mxu1 %v1832_v62 }
 0x9a1   : > { %3047 = vmatmul.msk.f32.vlgmr.msra.gmra.mxu1 %vm1280_vm2, %v1993_v29  ;;  %v1831_v29 = vld [vmem:[%s4421_s1 + $0x8] sm:$0xff] }
 0x9a2   : > { %2146 = vmatpush.msra.mxu2 %v1831_v29 }
 0xa16   : > { %v4110_v12 = vpop.f32.mrf.mxu1 }
 0xa1e   : > { %v2057_v14 = vpop.f32.mrf.mxu1 }
 0xa1f   : > { %v2058_v15 = vadd.f32 %v4057_v56, %v2057_v14 }
 0xa21   : > { %v2060_v16 = vsel %vm1898_vm10, %v2058_v15, -inf }
 0xa22   : > { %2061 = vmax.xlane.f32.xlu1 %v2060_v16 }
 0xa3b   : > { %2162 = vrot.lane.b32.xlu1 %v3921_v3, %s3438_s23 }
 0xa43   : > { %2158 = vrot.lane.b32.xlu1 %v3958_v18, %s3438_s23 }
 0xa4b   : > { %2154 = vrot.lane.b32.xlu1 %v3937_v9, %s3438_s23 }
 0xa53   : > { %2334 = vrot.lane.b32.xlu1 %v3905_v63, %s3439_s5 }
 0xa5b   : > { %2328 = vrot.lane.b32.xlu1 %v3917_v2, %s3439_s5 }
 0xa63   : > { %2324 = vrot.lane.b32.xlu1 %v3923_v6, %s3439_s5 }
 0xa6b   : > { %2318 = vrot.lane.b32.xlu1 %v3958_v18, %s3439_s5 }
 0xa73   : > { %2312 = vrot.lane.b32.xlu1 %v4014_v54, %s3439_s5 }
 0xa7b   : > { %3233 = vrot.lane.b32.xlu1 %v3970_v21, %s3436_s4 }
 0xa83   : > { %3243 = vrot.lane.b32.xlu1 %v3931_v8, %s3436_s4 }
 0xa8b   : > { %3248 = vrot.lane.b32.xlu1 %v4032_v55, %s3436_s4 }
 0xa93   : > { %3253 = vrot.lane.b32.xlu1 %v3945_v11, %s3436_s4 }
 0xa95   : > { %v2062_v2 = vpop.xlane.xlu1 %2061 }
 0xa96   : > { %v2063_v3 = vsub.f32 %v2058_v15, %v2062_v2 }
 0xa98   : > { %v2064_v6 = vmul.f32 1.442695, %v2063_v3 }
 0xa9a   : > { %3322 = vpow2.f32 %v2064_v6 }
 0xaa0   : > { %v3323_v18 = vpop.eup %3322 }
 0xaa1   : > { %v2066_v17 = vsel %vm1898_vm10, %v3323_v18, 0.0 }
 0xaa2   : > { %2067 = vadd.xlane.f32.xlu0 %v2066_v17 }
 0xaad   : > { %v2163_v54 = vpop.permute.xlu1 %2162 }
 0xaae   : > { %3057 = vmatpush.xpose.msk.msra.mxu0 %vm1280_vm2, %v2163_v54 }
 0xab2   : > { %3058 = vmatpush.xpose.msk.msra.mxu0 %vm1280_vm2, %v2161_v48 }
 0xab5   : > { %v2159_v20 = vpop.permute.xlu1 %2158 }
 0xab6   : > { %2330 = vrot.lane.b32.xlu0 %v3913_v1, %s3439_s5  ;;  %3059 = vmatpush.xpose.msk.msra.mxu0 %vm1280_vm2, %v2159_v20 }
 0xaba   : > { %3060 = vmatpush.xpose.msk.msra.mxu0 %vm1280_vm2, %v2157_v19 }
 0xabd   : > { %v2155_v22 = vpop.permute.xlu1 %2154 }
 0xabe   : > { %2320 = vrot.lane.b32.xlu0 %v3948_v13, %s3439_s5  ;;  %3061 = vmatpush.xpose.msk.msra.mxu0 %vm1280_vm2, %v2155_v22 }
 0xac5   : > { %v2335_v23 = vpop.permute.xlu1 %2334 }
 0xac6   : > { %2314 = vrot.lane.b32.xlu0 %v3937_v9, %s3439_s5  ;;  %3066 = vmatpush.xpose.msk.msrb.mxu3 %vm1280_vm2, %v2335_v23  ;;  %s4426_s5 = sld [smem:[#allocation41_spill]] }
 0xaca   : > { %3067 = vmatpush.xpose.msk.msrb.mxu3 %vm1280_vm2, %v2333_v24 }
 0xacc   : > { %s4427_s27 = scalar_lea.vmem %s4426_s5, %s3654_s24 }
 0xacd   : > { %v2329_v1 = vpop.permute.xlu1 %2328 }
 0xace   : > { %2251 = vrot.lane.b32.xlu0 %v3905_v63, %s3436_s4 }
 0xad5   : > { %v2325_v26 = vpop.permute.xlu1 %2324 }
 0xad6   : > { %3238 = vrot.lane.b32.xlu0 %v3983_v25, %s3436_s4  ;;  %s4424_s4 = sld [smem:[#allocation39_spill]] }
 0xadd   : > { %v2319_v9 = vpop.permute.xlu1 %2318 }
 0xae5   : > { %v2313_v31 = vpop.permute.xlu1 %2312 }
 0xaed   : > { %v3234_v34 = vpop.permute.xlu1 %3233 }
 0xaee   : > { %v3235_v38 = vunpack.i.l.bf16 %v3234_v34  ;;  %v3236_v39 = vunpack.i.h.bf16 %v3234_v34  ;;  %v1833_v34 = vld [vmem:[%s4421_s1 + $0x18] sm:$0xff] }
 0xaf5   : > { %v3244_v37 = vpop.permute.xlu1 %3243 }
 0xaf6   : > { %v3245_v45 = vunpack.i.l.bf16 %v3244_v37  ;;  %v3246_v47 = vunpack.i.h.bf16 %v3244_v37 }
 0xafd   : > { %v3249_v41 = vpop.permute.xlu1 %3248 }
 0xafe   : > { %v3250_v5 = vunpack.i.l.bf16 %v3249_v41  ;;  %v3251_v49 = vunpack.i.h.bf16 %v3249_v41 }
 0xb05   : > { %v3254_v48 = vpop.permute.xlu1 %3253 }
 0xb06   : > { %v3255_v50 = vunpack.i.l.bf16 %v3254_v48  ;;  %v3256_v51 = vunpack.i.h.bf16 %v3254_v48  ;;  %v2510_v48 = vld [vmem:[%s3749_s14 + $0x18] sm:$0xff] }
 0xb15   : > { %v2068_v13 = vpop.xlane.xlu0 %2067 }
 0xb16   : > { %3324 = vrcp.f32 %v2068_v13 }
 0xb1c   : > { %v3325_v27 = vpop.eup %3324 }
 0xb1d   : > { %v2070_v28 = vmul.f32 %v3325_v27, %v3323_v18 }
 0xb1f   : > { %3049 = vmatmul.msk.f32.vlgmr.msrb.gmra.mxu0 %vm1898_vm10, %v2070_v28 }
 0xb27   : > { %3062 = vmatmul.msk.f32.vlgmr.msra.gmra.mxu0 %vm1280_vm2, %v2153_v10 }
 0xb28   : > { %v2331_v30 = vpop.permute.xlu0 %2330 }
 0xb29   : > { %3068 = vmatpush.xpose.msk.msrb.mxu3 %vm1280_vm2, %v2331_v30 }
 0xb2d   : > { %3069 = vmatpush.xpose.msk.msrb.mxu3 %vm1280_vm2, %v2329_v1 }
 0xb30   : > { %v2321_v33 = vpop.permute.xlu0 %2320 }
 0xb31   : > { %3070 = vmatpush.xpose.msk.msrb.mxu3 %vm1280_vm2, %v2327_v32 }
 0xb35   : > { %3071 = vmatpush.xpose.msk.msrb.mxu3 %vm1280_vm2, %v2325_v26 }
 0xb38   : > { %v2315_v36 = vpop.permute.xlu0 %2314 }
 0xb39   : > { %3072 = vmatpush.xpose.msk.msrb.mxu3 %vm1280_vm2, %v2323_v35 }
 0xb3d   : > { %3073 = vmatpush.xpose.msk.msrb.mxu3 %vm1280_vm2, %v2321_v33 }
 0xb40   : > { %v2252_v7 = vpop.permute.xlu0 %2251 }
 0xb41   : > { %3063 = vmatpush.msk.msrb.mxu2 %vm1945_vm9, %v2252_v7  ;;  %3074 = vmatpush.xpose.msk.msrb.mxu3 %vm1280_vm2, %v2319_v9 }
 0xb43   : > { %2274 = vmatpush.msrb.mxu2 %v3235_v38 }
 0xb45   : > { %2275 = vmatpush.msrb.mxu2 %v3236_v39  ;;  %3075 = vmatpush.xpose.msk.msrb.mxu3 %vm1280_vm2, %v2317_v40 }
 0xb48   : > { %v3239_v42 = vpop.permute.xlu0 %3238 }
 0xb49   : > { %v3240_v43 = vunpack.i.l.bf16 %v3239_v42  ;;  %3076 = vmatpush.xpose.msk.msrb.mxu3 %vm1280_vm2, %v2315_v36  ;;  %v3241_v44 = vunpack.i.h.bf16 %v3239_v42 }
 0xb4b   : > { %2276 = vmatpush.msrb.mxu2 %v3240_v43 }
 0xb4c   : > { %3077 = vmatmul.msk.f32.vlgmr.msrb.gmra.mxu3 %vm1280_vm2, %v2313_v31 }
 0xb4d   : > { %2277 = vmatpush.msrb.mxu2 %v3241_v44 }
 0xb4f   : > { %2278 = vmatpush.msrb.mxu2 %v3245_v45 }
 0xb51   : > { %2279 = vmatpush.msrb.mxu2 %v3246_v47 }
 0xb53   : > { %2280 = vmatpush.msrb.mxu2 %v3250_v5 }
 0xb55   : > { %2281 = vmatpush.msrb.mxu2 %v3251_v49  ;;  %v2509_v49 = vld [vmem:[%s3749_s14 + $0x10] sm:$0xff] }
 0xb57   : > { %2282 = vmatpush.msrb.mxu2 %v3255_v50  ;;  %v2507_v50 = vld [vmem:[%s3749_s14] sm:$0xff] }
 0xb59   : > { %2283 = vmatpush.msrb.mxu2 %v3256_v51  ;;  %v2546_v51 = vld [vmem:[%s3759_s18 + $0x38] sm:$0xff] }
 0xb9c   : > { %v2125_v52 = vpop.f32.mrf.mxu0 }
 0xb9d   : > { %3050 = vmatmul.msk.f32.vlgmr.msra.gmra.mxu2 %vm1280_vm2, %v2125_v52  ;;  %v2545_v52 = vld [vmem:[%s3759_s18 + $0x30] sm:$0xff] }
 0xb9e   : > { %2466 = vmatpush.msra.mxu2 %v1833_v34 }
 0xba4   : > { %v2217_v53 = vpop.f32.mrf.mxu0 }
 0xba5   : > { %v2218_v57 = vadd.f32 %v4057_v56, %v2217_v53  ;;  %v2544_v53 = vld [vmem:[%s3759_s18 + $0x28] sm:$0xff] }
 0xba7   : > { %v2220_v58 = vsel %vm1898_vm10, %v2218_v57, -inf }
 0xba8   : > { %2221 = vmax.xlane.f32.xlu2 %v2220_v58 }
 0xbc0   : > { %2411 = vrot.lane.b32.xlu2 %v3905_v63, %s3437_s2 }
 0xbc8   : > { %3263 = vrot.lane.b32.xlu2 %v3983_v25, %s3437_s2 }
 0xbcf   : > { %v2377_v59 = vpop.f32.mrf.mxu3 }
 0xbd0   : > { %v2378_v60 = vadd.f32 %v4057_v56, %v2377_v59  ;;  %3268 = vrot.lane.b32.xlu2 %v3931_v8, %s3437_s2  ;;  %v2543_v59 = vld [vmem:[%s3759_s18 + $0x20] sm:$0xff] }
 0xbd2   : > { %v2380_v61 = vsel %vm1898_vm10, %v2378_v60, -inf }
 0xbd3   : > { %2381 = vmax.xlane.f32.xlu1 %v2380_v61  ;;  %v2542_v61 = vld [vmem:[%s3759_s18 + $0x18] sm:$0xff] }
 0xbec   : > { %3273 = vrot.lane.b32.xlu1 %v4032_v55, %s3437_s2 }
 0xc1b   : > { %v2222_v0 = vpop.xlane.xlu2 %2221 }
 0xc1c   : > { %v2223_v14 = vsub.f32 %v2218_v57, %v2222_v0 }
 0xc1e   : > { %v2224_v63 = vmul.f32 1.442695, %v2223_v14 }
 0xc20   : > { %3326 = vpow2.f32 %v2224_v63  ;;  %v2148_v9 = vpop.f32.mrf.mxu2 }
 0xc23   : > { %v2412_v15 = vpop.permute.xlu2 %2411 }
 0xc24   : > { %3078 = vmatpush.msk.msra.mxu1 %vm1945_vm9, %v2412_v15 }
 0xc26   : > { %v3327_v25 = vpop.eup %3326 }
 0xc27   : > { %v2226_v56 = vsel %vm1898_vm10, %v3327_v25, 0.0 }
 0xc28   : > { %2227 = vadd.xlane.f32.xlu0 %v2226_v56  ;;  %v3292_v56 = vld [vmem:[%s3769_s13 + $0x1] ss:$0 sm:$0xff] }
 0xc2b   : > { %v3264_v54 = vpop.permute.xlu2 %3263 }
 0xc2c   : > { %v3266_v10 = vunpack.i.h.bf16 %v3264_v54 }
 0xc33   : > { %v3269_v22 = vpop.permute.xlu2 %3268 }
 0xc34   : > { %v3270_v23 = vunpack.i.l.bf16 %v3269_v22  ;;  %v3271_v1 = vunpack.i.h.bf16 %v3269_v22 }
 0xc3c   : > { %3258 = vrot.lane.b32.xlu0 %v3970_v21, %s3437_s2 }
 0xc44   : > { %3278 = vrot.lane.b32.xlu0 %v3945_v11, %s3437_s2  ;;  %v3265_v11 = vunpack.i.l.bf16 %v3264_v54  ;;  %s4425_s2 = scalar_lea.vmem %s4424_s4, %s3654_s24  ;;  %v3294_v54 = vld [vmem:[%s4427_s27] ss:$0 sm:$0xff]  ;;  %s3088_s24 = sshll.u32 %s4429_s28, 1 }
 0xc45   : > { %v3291_v35 = vld [vmem:[%s4425_s2] ss:$0 sm:$0xff]  ;;  %s3358_s2 = scalar_lea.hbm %s4432_s19, 48 }
 0xc46   : > { %v2382_v8 = vpop.xlane.xlu1 %2381  ;;  %v1991_v36 = vadd.f32 %v3291_v35, %v4110_v12 }
 0xc47   : > { %v2383_v55 = vsub.f32 %v2378_v60, %v2382_v8 }
 0xc48   : > { %v2151_v37 = vadd.f32 %v2148_v9, %v1991_v36 }
 0xc49   : > { %v2384_v16 = vmul.f32 1.442695, %v2383_v55 }
 0xc4b   : > { %3328 = vpow2.f32 %v2384_v16  ;;  %v3293_v16 = vld [vmem:[%s3774_s15 + $0x1] ss:$0 sm:$0xff] }
 0xc51   : > { %v3329_v2 = vpop.eup %3328 }
 0xc52   : > { %v2386_v3 = vsel %vm1898_vm10, %v3329_v2, 0.0 }
 0xc53   : > { %2387 = vadd.xlane.f32.xlu2 %v2386_v3 }
 0xc5e   : > { %v3274_v24 = vpop.permute.xlu1 %3273 }
 0xc5f   : > { %v3275_v13 = vunpack.i.l.bf16 %v3274_v24  ;;  %v3276_v27 = vunpack.i.h.bf16 %v3274_v24 }
 0xc9b   : > { %v2228_v6 = vpop.xlane.xlu0 %2227 }
 0xc9c   : > { %3330 = vrcp.f32 %v2228_v6  ;;  %v2541_v6 = vld [vmem:[%s3759_s18 + $0x10] sm:$0xff] }
 0xca2   : > { %v3331_v18 = vpop.eup %3330 }
 0xca3   : > { %v2230_v17 = vmul.f32 %v3331_v18, %v3327_v25  ;;  %v2540_v18 = vld [vmem:[%s3759_s18 + $0x8] sm:$0xff] }
 0xca5   : > { %3064 = vmatmul.msk.f32.vlgmr.msrb.gmra.mxu2 %vm1898_vm10, %v2230_v17  ;;  %v2539_v17 = vld [vmem:[%s3759_s18] sm:$0xff]  ;;  %s4430_s18 = sld [smem:[#allocation10_spill]] }
 0xca6   : > { %2530 = vmatpush.msrb.mxu2 %v2510_v48 }
 0xca8   : > { %2531 = vmatpush.msrb.mxu2 %v2509_v49 }
 0xcae   : > { %v3259_v19 = vpop.permute.xlu0 %3258 }
 0xcaf   : > { %v3260_v21 = vunpack.i.l.bf16 %v3259_v19  ;;  %v3261_v20 = vunpack.i.h.bf16 %v3259_v19 }
 0xcb1   : > { %2434 = vmatpush.msra.mxu1 %v3260_v21 }
 0xcb3   : > { %2435 = vmatpush.msra.mxu1 %v3261_v20 }
 0xcb5   : > { %2436 = vmatpush.msra.mxu1 %v3265_v11  ;;  %v3295_v11 = vld [vmem:[%s1173_s30] ss:$0 sm:$0xff]  ;;  %s2623_s30 = sadd.s32 %s4430_s18, %s3088_s24 }
 0xcb6   : > { %v3279_v26 = vpop.permute.xlu0 %3278  ;;  %s3089_s21 = sshll.u32 %s2623_s30, 3 }
 0xcb7   : > { %2437 = vmatpush.msra.mxu1 %v3266_v10  ;;  %v3280_v28 = vunpack.i.l.bf16 %v3279_v26  ;;  %v3281_v29 = vunpack.i.h.bf16 %v3279_v26  ;;  %s2625_s1 = scalar_lea.hbm %s4432_s19, %s3089_s21 }
 0xcb8   : > { %s2629_s11 = sshll.u32 %s2625_s1, 4  ;;  %s2630_s11 = int_to_ptr.hbm [resolvable:$true] %s2629_s11 }
 0xcb9   : > { %2438 = vmatpush.msra.mxu1 %v3270_v23  ;;  %s3352_s29 = sshra.s32 %s2630_s11, 4  ;;  %s3353_s29 = int_to_ptr.hbm [resolvable:$true] %s3352_s29 }
 0xcba   : > { %s3354_s26 = scalar_lea.hbm %s3353_s29, 8  ;;  %p3359_p5 = scmp.lt.s32.totalorder %s3353_s29, %s4432_s19 }
 0xcbb   : > { %2439 = vmatpush.msra.mxu1 %v3271_v1  ;;  %p3355_p1 = scmp.ne.s32.totalorder %s3353_s29, %s3354_s26  ;;  %p3360_p6 = scmp.lt.s32.totalorder %s3358_s2, %s3354_s26 }
 0xcbd   : > { %2440 = vmatpush.msra.mxu1 %v3275_v13  ;;  %p3356_p2 = pnand %p3355_p1, %p3623_p3  ;;  %p3361_p7 = por %p3360_p6, %p3359_p5 }
 0xcbf   : > { %2441 = vmatpush.msra.mxu1 %v3276_v27  ;;  %p3357_p4 = pneg %p3356_p2 }
 0xcc1   : > { %2442 = vmatpush.msra.mxu1 %v3280_v28  ;;  %p3362_p9 = pnand %p3361_p7, %p3357_p4 }
 0xcc3   : > { %2443 = vmatpush.msra.mxu1 %v3281_v29 }
 0xcc6   : > { %v2388_v30 = vpop.xlane.xlu2 %2387 }
 0xcc7   : > { %3332 = vrcp.f32 %v2388_v30 }
 0xccd   : > { %v3333_v32 = vpop.eup %3332 }
 0xcce   : > { %v2390_v33 = vmul.f32 %v3333_v32, %v3329_v2 }
 0xd28   : > { %v2285_v31 = vpop.f32.mrf.mxu2 }
 0xd29   : > { %3065 = vmatmul.msk.f32.vlgmr.msrb.gmra.mxu1 %vm1280_vm2, %v2285_v31 }
 0xd2a   : > { %2563 = vmatpush.msrb.mxu1 %v2546_v51 }
 0xd2c   : > { %2564 = vmatpush.msrb.mxu1 %v2545_v52 }
 0xd2e   : > { %2565 = vmatpush.msrb.mxu1 %v2544_v53 }
 0xd30   : > { %2566 = vmatpush.msrb.mxu1 %v2543_v59 }
 0xd31   : > { %3079 = vmatmul.msk.f32.vlgmr.msra.gmra.mxu1 %vm1898_vm10, %v2390_v33 }
 0xd32   : > { %2567 = vmatpush.msrb.mxu1 %v2542_v61 }
 0xd34   : > { %2568 = vmatpush.msrb.mxu1 %v2541_v6 }
 0xd36   : > { %2569 = vmatpush.msrb.mxu1 %v2540_v18 }
 0xd38   : > { %2570 = vmatpush.msrb.mxu1 %v2539_v17 }
 0xda6   : > { %v2308_v7 = vpop.f32.mrf.mxu1 }
 0xda7   : > { %v2311_v38 = vadd.f32 %v2308_v7, %v2151_v37  ;;  %v3296_v37 = vld [vmem:[%s3769_s13 + $0x2] ss:$0 sm:$0xff]  ;;  %s4434_s13 = sand.u32 1, %s4431_s20  }
 0xda8   : > { %s2613_s12 = scalar_lea.sflag [#allocation4], %s4434_s13 }
 0xdae   : > { %v2445_v39 = vpop.f32.mrf.mxu1 }
 0xdaf   : > { %3080 = vmatmul.msk.f32.vlgmr.msra.gmra.mxu2 %vm1280_vm2, %v2445_v39 }
 0xe32   : > { %v2468_v40 = vpop.f32.mrf.mxu2 }
 0xe33   : > { %v2471_v41 = vadd.f32 %v2468_v40, %v2311_v38  ;;  %v3297_v38 = vld [vmem:[%s3774_s15 + $0x2] ss:$0 sm:$0xff] }
 0xe35   : > { %v2472_v42 = vadd.f32 %v2471_v41, %v3998_v4  ;;  %v2508_v4 = vld [vmem:[%s3749_s14 + $0x8] sm:$0xff] }
 0xe36   : > { %2532 = vmatpush.msrb.mxu2 %v2508_v4 }
 0xe37   : > { %v2477_v43 = vsel %vm1213_vm1, %v2472_v42, 0.0 }
 0xe38   : > { %2478 = vadd.xlane.f32.xlu0 %v2477_v43  ;;  %2533 = vmatpush.msrb.mxu2 %v2507_v50 }
 0xeab   : > { %v2479_v12 = vpop.xlane.xlu0 %2478 }
 0xeac   : > { %v2480_v44 = vmul.f32 %v2479_v12, %v3892_v46 }
 0xeae   : > { %v2481_v45 = vsub.f32 %v2472_v42, %v2480_v44 }
 0xeb0   : > { %v2482_v47 = vmul.f32 %v2481_v45, %v2481_v45 }
 0xeb2   : > { %v2483_v5 = vsel %vm1213_vm1, %v2482_v47, 0.0 }
 0xeb3   : > { %2484 = vadd.xlane.f32.xlu1 %v2483_v5 }
 0xf26   : > { %v2485_v57 = vpop.xlane.xlu1 %2484 }
 0xf27   : > { %v2486_v58 = vmul.f32 %v2485_v57, %v3892_v46 }
 0xf29   : > { %v2487_v60 = vadd.f32 1e-05, %v2486_v58 }
 0xf2b   : > { %3334 = vrsqrt.f32 %v2487_v60  ;;  %vm2494_vm12 = vweird.f32 %v2487_v60 }
 0xf31   : > { %v3335_v62 = vpop.eup %3334 }
 0xf32   : > { %v2489_v0 = vmul.f32 %v3335_v62, %v2487_v60  ;;  %vm2495_vm11 = vweird.f32 %v3335_v62 }
 0xf33   : > { %vm2496_vm13 = vmor %vm2494_vm12, %vm2495_vm11 }
 0xf34   : > { %v2490_v14 = vmul.f32 %v3335_v62, %v2489_v0 }
 0xf36   : > { %v2491_v63 = vmul.f32 0.5, %v2490_v14 }
 0xf38   : > { %v2492_v15 = vsub.f32 1.5, %v2491_v63 }
 0xf3a   : > { %v2493_v25 = vmul.f32 %v3335_v62, %v2492_v15 }
 0xf3c   : > { %v2497_v8 = vsel %vm2496_vm13, %v3335_v62, %v2493_v25 }
 0xf3d   : > { %v2498_v55 = vmul.f32 %v2497_v8, %v2481_v45 }
 0xf3f   : > { %v2502_v2 = vmul.f32 %v3292_v56, %v2498_v55 }
 0xf41   : > { %v2506_v3 = vadd.f32 %v3293_v16, %v2502_v2 }
 0xf43   : > { %3083 = vmatmul.msk.f32.vlgmr.msrb.gmra.mxu2 %vm1213_vm1, %v2506_v3 }
 0xfc6   : > { %v2535_v19 = vpop.f32.mrf.mxu2 }
 0xfc7   : > { %v2536_v21 = vadd.f32 %v3294_v54, %v2535_v19 }
 0xfc9   : > { %v2538_v20 = vmax.f32 %v2536_v21, 0.0 }
 0xfcb   : > { %3084 = vmatmul.msk.f32.vlgmr.msrb.gmra.mxu1 %vm2551_vm14, %v2538_v20 }
0x1048   : > { %v2572_v22 = vpop.f32.mrf.mxu1 }
0x1049   : > { %v2573_v10 = vadd.f32 %v3295_v11, %v2572_v22 }
0x104b   : > { %v2575_v23 = vadd.f32 %v2573_v10, %v2506_v3 }
0x104d   : > { %v2580_v24 = vsel %vm1213_vm1, %v2575_v23, 0.0 }
0x104e   : > { %2581 = vadd.xlane.f32.xlu2 %v2580_v24 }
0x10c1   : > { %v2582_v1 = vpop.xlane.xlu2 %2581 }
0x10c2   : > { %v2583_v13 = vmul.f32 %v2582_v1, %v3892_v46 }
0x10c4   : > { %v2584_v26 = vsub.f32 %v2575_v23, %v2583_v13 }
0x10c6   : > { %v2585_v27 = vmul.f32 %v2584_v26, %v2584_v26 }
0x10c8   : > { %v2586_v28 = vsel %vm1213_vm1, %v2585_v27, 0.0 }
0x10c9   : > { %2587 = vadd.xlane.f32.xlu2 %v2586_v28 }
0x113c   : > { %v2588_v29 = vpop.xlane.xlu2 %2587 }
0x113d   : > { %v2589_v9 = vmul.f32 %v2588_v29, %v3892_v46 }
0x113f   : > { %v2590_v30 = vadd.f32 1e-05, %v2589_v9 }
0x1141   : > { %3336 = vrsqrt.f32 %v2590_v30  ;;  %vm2597_vm0 = vweird.f32 %v2590_v30 }
0x1147   : > { %v3337_v31 = vpop.eup %3336 }
0x1148   : > { %v2592_v32 = vmul.f32 %v3337_v31, %v2590_v30  ;;  %vm2598_vm15 = vweird.f32 %v3337_v31 }
0x1149   : > { %vm2599_vm2 = vmor %vm2597_vm0, %vm2598_vm15 }
0x114a   : > { %v2593_v33 = vmul.f32 %v3337_v31, %v2592_v32 }
0x114c   : > { %v2594_v34 = vmul.f32 0.5, %v2593_v33 }
0x114e   : > { %v2595_v35 = vsub.f32 1.5, %v2594_v34 }
0x1150   : > { %v2596_v36 = vmul.f32 %v3337_v31, %v2595_v35 }
0x1152   : > { %v2600_v46 = vsel %vm2599_vm2, %v3337_v31, %v2596_v36 }
0x1153   : > { %v2601_v7 = vmul.f32 %v2600_v46, %v2584_v26 }
0x1155   : > { %v2605_v39 = vmul.f32 %v3296_v37, %v2601_v7 }
0x1157   : > { %v2609_v40 = vadd.f32 %v3297_v38, %v2605_v39 }
0x1159   : > { %2610 = vst.msk [vmem:[#allocation2] sm:$0xff] %vm1213_vm1, %v2609_v40 }
0x115a   : > { %2611 = vst.msk [vmem:[%s1081_s0] sm:$0xff] %vm1213_vm1, %v2609_v40 }
0x115b   : > { %3365 = shalt.err (!%p3362_p9)
}
0x115c   : > { %3103 = dma.vmem_to_hbm [thread:$0]  (%p3623_p3), %s2628_s9, 128, %s2630_s11, %s2613_s12  }
0x115d PF: > { %s4435_s3 = sld [smem:[#allocation13_spill]] }
0x115e   : > { %s4436_s0 = sld [smem:[#allocation6_spill]] }
0x1163   : > { %p3109_p10 = scmp.ge.s32.totalorder %s4435_s3, 2 }
0x1164   : > { %s2641_s27 = sand.u32 1, %s4436_s0  }
0x1165   : > { %p3106_p11 = pnand %p3109_p10, %p3632_p8  ;;  %s2642_s25 = scalar_lea.sflag [#allocation4], %s2641_s27 }
0x1167   : > { %p3107_p12 = pneg %p3106_p11 }
0x1169   : > { %3399 = dma.done.wait (%p3107_p12), %s2642_s25, 128  }
0x116a   : > { %3401 = vsyncadd (%p3107_p12), %s2642_s25, 4294967168  ;;  %s38_s1 = sadd.s32 1, %s4435_s3   ;;  %s4438_s29 = sld [smem:[#allocation7_spill]] }
0x116b   : > { %p35_p13 = scmp.ge.s32.totalorder %s38_s1, 8   ;;  %s4439_s2 = sld [smem:[#allocation8_spill]] }
0x116c   : > { %s4440_s6 = sld [smem:[#allocation18_spill]] }
0x116d   : > { %s4441_s30 = sld [smem:[#allocation11_spill]]  ;;  %37 = sbr.rel (!%p35_p13) target bundleno = 30 (0x1e), region = 235 }
0x116e   : > { %s4442_s7 = sld [smem:[#allocation12_spill]] }
0x116f   : > { %s4443_s3 = sld [smem:[#allocation14_spill]] }
0x1170   : > { %s4444_s26 = sld [smem:[#allocation16_spill]] }
0x1172   :  { %2648 = vsyncpa [#allocation4], 1 }
0x1173   :  { %2650 = vsyncpa [#allocation4 + $0x1], 1 }

</bundles_post_ra>
